<compile_context>
chip_gen: v7x
topology: tpu7x:2x2x1
jax: 0.10.0
libtpu: 0.0.40
codegen_flags: <defaults>
</compile_context>

<pallas_src>
import functools

import jax
import jax.numpy as jnp
from jax import lax
from jax.experimental import pallas as pl
from jax.experimental.pallas import tpu as pltpu

P = 4  # dim_scale: the module hardcodes a 16*dim expansion => p1 = p2 = 4


def _expand_ln_rearrange_kernel(x_ref, w_ref, s_ref, st_ref, g_ref, b_ref, o_ref,
                                *, C, eps, w_resident):
    # x_ref : (kh, W, C)          input tokens for kh whole image rows
    # w_ref : (P, C, P*C)         full weight (resident)  OR (1, C, P*C) slab
    # s_ref : (P*C, P)            one-hot: lane j belongs to C-chunk j // C
    # st_ref: (P, P*C)            transpose of s_ref (broadcast-back)
    # g_ref, b_ref: (1, P*C)      gamma / beta tiled P times along lanes
    # o_ref : (kh, 1, W, P*C)     output slab (B*H, p1, W, p2*C) for this (j, p1)
    kh, W, _ = x_ref.shape
    R = kh * W

    x = x_ref[...].reshape(R, C)
    if w_resident:
        w_slab = w_ref[pl.program_id(1)]      # (C, P*C) slab for this p1
    else:
        w_slab = w_ref[0]                     # streamed slab already selected

    hi = lax.Precision.HIGHEST
    y = jnp.dot(x, w_slab, precision=hi, preferred_element_type=jnp.float32)  # (R, P*C)

    # Segmented LayerNorm stats via tiny one-hot MXU matmuls: keeps everything
    # at full 4*C lane width (no sub-128-lane reshapes).  HIGHEST => exact f32.
    S = s_ref[...]                            # (P*C, P)
    S_t = st_ref[...]                         # (P, P*C)
    inv_c = jnp.float32(1.0 / C)
    mu = jnp.dot(y, S, precision=hi, preferred_element_type=jnp.float32) * inv_c
    yc = y - jnp.dot(mu, S_t, precision=hi, preferred_element_type=jnp.float32)
    var = jnp.dot(yc * yc, S, precision=hi, preferred_element_type=jnp.float32) * inv_c
    rstd = lax.rsqrt(var + eps)
    yn = yc * jnp.dot(rstd, S_t, precision=hi, preferred_element_type=jnp.float32)
    yn = yn * g_ref[...] + b_ref[...]

    o_ref[...] = yn.reshape(kh, 1, W, P * C).astype(o_ref.dtype)


def _vmem_capacity_bytes():
    try:
        return int(pltpu.get_tpu_info().vmem_capacity_bytes)
    except Exception:
        return 64 * 2**20  # conservative fallback (v7x per-TC VMEM)


def _pick_row_tile(BH, W, C, in_esize, out_esize, budget_bytes, *, max_rows=2048):
    """Largest kh dividing B*H whose per-step working set fits `budget_bytes`."""
    lanes_c = -(-C // 128) * 128
    sub_w = -(-W // 8) * 8
    best = 1
    for kh in range(1, BH + 1):
        if BH % kh:
            continue
        rows = kh * W
        if rows > max_rows:
            continue
        est = (2 * kh * sub_w * lanes_c * in_esize   # x tile (padded), double-buffered
               + 2 * rows * P * C * out_esize        # output tile, double-buffered
               + 4 * rows * P * C * 4)               # f32 temporaries (y, yc, bcasts, yn)
        if est <= budget_bytes:
            best = kh
    return best


def final_patch_expand_x4(x, w_expand, gamma, beta, *, input_resolution, dim,
                          dim_scale=4, eps=1e-5):
    """x: (B, H*W, C); w_expand: (C, 16C) == nn.Linear weight transposed.
    Returns (B, (4*H)*(4*W), C)."""
    H, W = input_resolution
    B, L, C = x.shape
    if L != H * W:
        raise ValueError("input feature has wrong size")
    if C != dim:
        raise ValueError("channel dim mismatch")
    if dim_scale != P:
        raise ValueError("FinalPatchExpand_X4 is defined for dim_scale == 4")
    if (P * C) % 128 != 0:
        # TODO(synk): unfused fallback (matmul+LN kernel, rearrange in JAX) for
        # channel counts where 4*dim is not lane-aligned (never hit by Swin-UNet).
        raise NotImplementedError("kernel requires (4 * dim) % 128 == 0")

    BH = B * H
    x3 = x.reshape(BH, W, C)

    # Weight reorganised as (P, C, 4C): w_p[p] == w_expand[:, p*4C:(p+1)*4C].
    w_p = w_expand.reshape(C, P, P * C).transpose(1, 0, 2)

    g_tiled = jnp.tile(gamma.astype(jnp.float32), P).reshape(1, P * C)
    b_tiled = jnp.tile(beta.astype(jnp.float32), P).reshape(1, P * C)

    # One-hot chunk matrices for the segmented LN stats: built ONCE here and
    # passed as constant-index inputs (hoisted out of the kernel body).
    seg = jnp.arange(P * C, dtype=jnp.int32) // C
    S = (seg[:, None] == jnp.arange(P, dtype=jnp.int32)[None, :]).astype(jnp.float32)
    S_t = S.T

    in_esize = jnp.dtype(x.dtype).itemsize
    out_esize = in_esize
    w_esize = jnp.dtype(w_expand.dtype).itemsize

    # Generation-aware VMEM budgeting.
    vmem_cap = _vmem_capacity_bytes()
    w_full_bytes = 2 * P * C * (P * C) * w_esize             # double-buffered resident copy
    w_resident = w_full_bytes <= min(16 * 2**20, vmem_cap // 5)
    w_vmem = w_full_bytes if w_resident else 2 * C * (P * C) * w_esize

    ws_cap = min(48 * 2**20, int(vmem_cap * 0.45)) - w_vmem  # tile working-set budget
    kh = _pick_row_tile(BH, W, C, in_esize, out_esize, max(ws_cap, 2**20))
    rows = kh * W

    # Row tile SLOW, p1 FAST: x block index constant across p1 -> DMA skipped.
    grid = (BH // kh, P)

    if w_resident:
        w_spec = pl.BlockSpec((P, C, P * C), lambda j, p: (0, 0, 0))     # fetched once
    else:
        w_spec = pl.BlockSpec((1, C, P * C), lambda j, p: (p, 0, 0))     # stream slab

    lanes_c = -(-C // 128) * 128
    sub_w = -(-W // 8) * 8
    est = (w_vmem
           + 2 * kh * sub_w * lanes_c * in_esize
           + 2 * rows * P * C * out_esize
           + 4 * rows * P * C * 4
           + (-(-(P * C) // 8) * 8) * 128 * 4 * 2           # S / S_t (padded)
           + (1 << 20))                                      # gamma/beta + slack
    limit_cap = min(64 * 2**20, int(vmem_cap * 0.70))
    vmem_limit = int(min(limit_cap, max(16 * 2**20, 3 * est // 2)))

    out = pl.pallas_call(
        functools.partial(_expand_ln_rearrange_kernel, C=C, eps=eps,
                          w_resident=w_resident),
        out_shape=jax.ShapeDtypeStruct((BH, P, W, P * C), x.dtype),
        grid_spec=pltpu.PrefetchScalarGridSpec(
            num_scalar_prefetch=0,
            grid=grid,
            in_specs=[
                pl.BlockSpec((kh, W, C), lambda j, p: (j, 0, 0)),   # tokens (read once)
                w_spec,                                             # weight
                pl.BlockSpec((P * C, P), lambda j, p: (0, 0)),      # S (one-hot)
                pl.BlockSpec((P, P * C), lambda j, p: (0, 0)),      # S_t
                pl.BlockSpec((1, P * C), lambda j, p: (0, 0)),      # gamma (tiled)
                pl.BlockSpec((1, P * C), lambda j, p: (0, 0)),      # beta  (tiled)
            ],
            out_specs=pl.BlockSpec((kh, 1, W, P * C), lambda j, p: (j, p, 0, 0)),
        ),
        compiler_params=pltpu.CompilerParams(
            # Shard the ROW axis across v7x's two TensorCores; p1 stays serial so
            # the constant-block-index x reuse holds per core.
            dimension_semantics=("parallel", "arbitrary"),
            vmem_limit_bytes=vmem_limit,
        ),
    )(x3, w_p, S, S_t, g_tiled, b_tiled)

    # (B*H, p1, W, p2*C) == (B, H, p1, W, p2, C) -> (B, (H p1)(W p2), C).
    # Contiguous row-major reshape => pure metadata, no extra HBM pass.
    return out.reshape(B, H * P * W * P, C)


# ----------------------- Reference (pure JAX, torch semantics) -----------------------

def _reference(x, w_expand, gamma, beta, *, input_resolution, dim, eps=1e-5):
    H, W = input_resolution
    B, L, C = x.shape
    y = jnp.einsum("blc,cd->bld", x, w_expand, precision="highest")   # (B, L, 16C)
    y = y.reshape(B, H, W, P, P, dim)
    y = jnp.transpose(y, (0, 1, 3, 2, 4, 5)).reshape(B, H * P * W * P, dim)
    mean = jnp.mean(y, axis=-1, keepdims=True)
    var = jnp.mean((y - mean) ** 2, axis=-1, keepdims=True)
    return (y - mean) * lax.rsqrt(var + eps) * gamma + beta


if __name__ == "__main__":
    B, H, W, dim = 2, 8, 8, 32
    input_resolution = (H, W)

    key = jax.random.PRNGKey(0)
    kx, kw, kg, kb = jax.random.split(key, 4)
    x = jax.random.normal(kx, (B, H * W, dim), dtype=jnp.float32)
    # nn.Linear(dim, 16*dim, bias=False) weight, stored transposed as (C, 16C)
    # so the kernel computes x @ W.
    w_expand = jax.random.normal(kw, (dim, 16 * dim), dtype=jnp.float32) * 0.02
    gamma = 1.0 + 0.1 * jax.random.normal(kg, (dim,), dtype=jnp.float32)
    beta = 0.1 * jax.random.normal(kb, (dim,), dtype=jnp.float32)

    out = final_patch_expand_x4(
        x, w_expand, gamma, beta,
        input_resolution=input_resolution, dim=dim, dim_scale=4,
    )
    out = jax.block_until_ready(out)

    ref = _reference(x, w_expand, gamma, beta,
                     input_resolution=input_resolution, dim=dim)
    assert out.shape == (B, 4 * H * 4 * W, dim), out.shape
    max_err = float(jnp.max(jnp.abs(out - ref)))
    # Both kernel and reference run exact-f32 matmuls (HIGHEST) -> tight bound.
    assert max_err < 1e-3, max_err

    print("KERNEL_OK")
</pallas_src>

<mosaic_0001>
module attributes {stable_mosaic.version = 11 : i64} {
  func.func @_expand_ln_rearrange_kernel(%arg0: i32, %arg1: i32, %arg2: memref<16x8x32xf32, #tpu.memory_space<vmem>>, %arg3: memref<4x32x128xf32, #tpu.memory_space<vmem>>, %arg4: memref<128x4xf32, #tpu.memory_space<vmem>>, %arg5: memref<4x128xf32, #tpu.memory_space<vmem>>, %arg6: memref<1x128xf32, #tpu.memory_space<vmem>>, %arg7: memref<1x128xf32, #tpu.memory_space<vmem>>, %arg8: memref<16x1x8x128xf32, #tpu.memory_space<vmem>>) attributes {dimension_semantics = [#tpu.dimension_semantics<parallel>, #tpu.dimension_semantics<arbitrary>], iteration_bounds = array<i64: 1, 4>, scalar_prefetch = 0 : i64, scratch_operands = 0 : i64, tpu.core_type = #tpu.core_type<tc>, window_params = [{transform_indices = @transform_0, window_bounds = array<i64: 16, 8, 32>}, {pipeline_mode = #tpu.pipeline_mode<synchronous>, transform_indices = @transform_1, window_bounds = array<i64: 4, 32, 128>}, {pipeline_mode = #tpu.pipeline_mode<synchronous>, transform_indices = @transform_2, window_bounds = array<i64: 128, 4>}, {pipeline_mode = #tpu.pipeline_mode<synchronous>, transform_indices = @transform_3, window_bounds = array<i64: 4, 128>}, {pipeline_mode = #tpu.pipeline_mode<synchronous>, transform_indices = @transform_4, window_bounds = array<i64: 1, 128>}, {pipeline_mode = #tpu.pipeline_mode<synchronous>, transform_indices = @transform_5, window_bounds = array<i64: 1, 128>}, {transform_indices = @transform_6, window_bounds = array<i64: 16, 1, 8, 128>}]} {
    %c0 = arith.constant 0 : index
    %c0_0 = arith.constant 0 : index
    %c0_1 = arith.constant 0 : index
    %0 = vector.load %arg2[%c0, %c0_0, %c0_1] : memref<16x8x32xf32, #tpu.memory_space<vmem>>, vector<16x8x32xf32>
    %1 = vector.shape_cast %0 : vector<16x8x32xf32> to vector<128x32xf32>
    %2 = arith.index_cast %arg1 : i32 to index
    %c0_2 = arith.constant 0 : index
    %c0_3 = arith.constant 0 : index
    %3 = vector.load %arg3[%2, %c0_2, %c0_3] : memref<4x32x128xf32, #tpu.memory_space<vmem>>, vector<1x32x128xf32>
    %4 = vector.shape_cast %3 : vector<1x32x128xf32> to vector<32x128xf32>
    %cst = arith.constant dense<0.000000e+00> : vector<128x128xf32>
    %5 = tpu.matmul %1, %4, %cst {dimension_numbers = #tpu.dot_dimension_numbers<[1], [0], [0], [1], [0, 0, 1, 1], [], []>, precision = #tpu.contract_precision<fp32>} : vector<128x32xf32>, vector<32x128xf32>, vector<128x128xf32> -> vector<128x128xf32>
    %c0_4 = arith.constant 0 : index
    %c0_5 = arith.constant 0 : index
    %6 = vector.load %arg4[%c0_4, %c0_5] : memref<128x4xf32, #tpu.memory_space<vmem>>, vector<128x4xf32>
    %c0_6 = arith.constant 0 : index
    %c0_7 = arith.constant 0 : index
    %7 = vector.load %arg5[%c0_6, %c0_7] : memref<4x128xf32, #tpu.memory_space<vmem>>, vector<4x128xf32>
    %cst_8 = arith.constant dense<0.000000e+00> : vector<128x4xf32>
    %8 = tpu.matmul %5, %6, %cst_8 {dimension_numbers = #tpu.dot_dimension_numbers<[1], [0], [0], [1], [0, 0, 1, 1], [], []>, precision = #tpu.contract_precision<fp32>} : vector<128x128xf32>, vector<128x4xf32>, vector<128x4xf32> -> vector<128x4xf32>
    %cst_9 = arith.constant 3.125000e-02 : f32
    %9 = vector.broadcast %cst_9 : f32 to vector<128x4xf32>
    %10 = arith.mulf %8, %9 : vector<128x4xf32>
    %cst_10 = arith.constant dense<0.000000e+00> : vector<128x128xf32>
    %11 = tpu.matmul %10, %7, %cst_10 {dimension_numbers = #tpu.dot_dimension_numbers<[1], [0], [0], [1], [0, 0, 1, 1], [], []>, precision = #tpu.contract_precision<fp32>} : vector<128x4xf32>, vector<4x128xf32>, vector<128x128xf32> -> vector<128x128xf32>
    %12 = arith.subf %5, %11 : vector<128x128xf32>
    %13 = arith.mulf %12, %12 : vector<128x128xf32>
    %cst_11 = arith.constant dense<0.000000e+00> : vector<128x4xf32>
    %14 = tpu.matmul %13, %6, %cst_11 {dimension_numbers = #tpu.dot_dimension_numbers<[1], [0], [0], [1], [0, 0, 1, 1], [], []>, precision = #tpu.contract_precision<fp32>} : vector<128x128xf32>, vector<128x4xf32>, vector<128x4xf32> -> vector<128x4xf32>
    %cst_12 = arith.constant 3.125000e-02 : f32
    %15 = vector.broadcast %cst_12 : f32 to vector<128x4xf32>
    %16 = arith.mulf %14, %15 : vector<128x4xf32>
    %cst_13 = arith.constant 9.99999974E-6 : f32
    %17 = vector.broadcast %cst_13 : f32 to vector<128x4xf32>
    %18 = arith.addf %16, %17 : vector<128x4xf32>
    %19 = math.rsqrt %18 : vector<128x4xf32>
    %cst_14 = arith.constant dense<0.000000e+00> : vector<128x128xf32>
    %20 = tpu.matmul %19, %7, %cst_14 {dimension_numbers = #tpu.dot_dimension_numbers<[1], [0], [0], [1], [0, 0, 1, 1], [], []>, precision = #tpu.contract_precision<fp32>} : vector<128x4xf32>, vector<4x128xf32>, vector<128x128xf32> -> vector<128x128xf32>
    %21 = arith.mulf %12, %20 : vector<128x128xf32>
    %c0_15 = arith.constant 0 : index
    %c0_16 = arith.constant 0 : index
    %22 = vector.load %arg6[%c0_15, %c0_16] : memref<1x128xf32, #tpu.memory_space<vmem>>, vector<1x128xf32>
    %23 = vector.broadcast %22 : vector<1x128xf32> to vector<128x128xf32>
    %24 = arith.mulf %21, %23 : vector<128x128xf32>
    %c0_17 = arith.constant 0 : index
    %c0_18 = arith.constant 0 : index
    %25 = vector.load %arg7[%c0_17, %c0_18] : memref<1x128xf32, #tpu.memory_space<vmem>>, vector<1x128xf32>
    %26 = vector.broadcast %25 : vector<1x128xf32> to vector<128x128xf32>
    %27 = arith.addf %24, %26 : vector<128x128xf32>
    %28 = vector.shape_cast %27 : vector<128x128xf32> to vector<16x1x8x128xf32>
    %c0_19 = arith.constant 0 : index
    %c0_20 = arith.constant 0 : index
    %c0_21 = arith.constant 0 : index
    %c0_22 = arith.constant 0 : index
    %29 = vector.load %arg8[%c0_19, %c0_20, %c0_21, %c0_22] : memref<16x1x8x128xf32, #tpu.memory_space<vmem>>, vector<16x1x8x128xf32>
    tpu.vector_store %arg8[%c0_19, %c0_20, %c0_21, %c0_22], %28 {strides = array<i32>} : memref<16x1x8x128xf32, #tpu.memory_space<vmem>>, vector<16x1x8x128xf32>,
    return
  }
  func.func @transform_0(%arg0: i32, %arg1: i32) -> (i32, i32, i32) {
    %c0_i32 = arith.constant 0 : i32
    %c0_i32_0 = arith.constant 0 : i32
    %c0_i32_1 = arith.constant 0 : i32
    return %arg0, %c0_i32, %c0_i32_0 : i32, i32, i32
  }
  func.func @transform_1(%arg0: i32, %arg1: i32) -> (i32, i32, i32) {
    %c0_i32 = arith.constant 0 : i32
    %c0_i32_0 = arith.constant 0 : i32
    %c0_i32_1 = arith.constant 0 : i32
    %c0_i32_2 = arith.constant 0 : i32
    return %c0_i32, %c0_i32_0, %c0_i32_1 : i32, i32, i32
  }
  func.func @transform_2(%arg0: i32, %arg1: i32) -> (i32, i32) {
    %c0_i32 = arith.constant 0 : i32
    %c0_i32_0 = arith.constant 0 : i32
    %c0_i32_1 = arith.constant 0 : i32
    return %c0_i32, %c0_i32_0 : i32, i32
  }
  func.func @transform_3(%arg0: i32, %arg1: i32) -> (i32, i32) {
    %c0_i32 = arith.constant 0 : i32
    %c0_i32_0 = arith.constant 0 : i32
    %c0_i32_1 = arith.constant 0 : i32
    return %c0_i32, %c0_i32_0 : i32, i32
  }
  func.func @transform_4(%arg0: i32, %arg1: i32) -> (i32, i32) {
    %c0_i32 = arith.constant 0 : i32
    %c0_i32_0 = arith.constant 0 : i32
    %c0_i32_1 = arith.constant 0 : i32
    return %c0_i32, %c0_i32_0 : i32, i32
  }
  func.func @transform_5(%arg0: i32, %arg1: i32) -> (i32, i32) {
    %c0_i32 = arith.constant 0 : i32
    %c0_i32_0 = arith.constant 0 : i32
    %c0_i32_1 = arith.constant 0 : i32
    return %c0_i32, %c0_i32_0 : i32, i32
  }
  func.func @transform_6(%arg0: i32, %arg1: i32) -> (i32, i32, i32, i32) {
    %c0_i32 = arith.constant 0 : i32
    %c0_i32_0 = arith.constant 0 : i32
    %c0_i32_1 = arith.constant 0 : i32
    return %arg0, %arg1, %c0_i32, %c0_i32_0 : i32, i32, i32, i32
  }
}

</mosaic_0001>

<bundles_post_ra>
// kernel: tpu_custom_call.1
= control target key start
LH: loop header
LB: loop body
LE: loop exit
PB: predicated region body
PF: predicated region fallthrough
CT: control target
= control target key end

     0   :  { %11 = vsyncpa [#allocation3], 0  ;;  %s11843_s0 = inlined_call_operand.vmem [shape: f32[16,8,32], index: 0, kind: input, shape index: {}]   ;;  %s11844_s1 = inlined_call_operand.hbm [shape: f32[4,32,128], index: 1, kind: input, shape index: {}]   ;;  %s11845_s2 = inlined_call_operand.vmem [shape: f32[128,4], index: 2, kind: input, shape index: {}]   ;;  %s11846_s3 = inlined_call_operand.vmem [shape: f32[4,128], index: 3, kind: input, shape index: {}]   ;;  %s11847_s4 = inlined_call_operand.vmem [shape: f32[1,128], index: 4, kind: input, shape index: {}]   ;;  %s11848_s5 = inlined_call_operand.vmem [shape: f32[1,128], index: 5, kind: input, shape index: {}]   ;;  %s11849_s6 = inlined_call_operand.hbm [shape: f32[16,4,8,128], index: 6, kind: output, shape index: {}]  }
   0x1   :  { %12 = vsyncpa [#allocation4], 0 }
   0x2   :  { %14 = vsyncpa [#allocation4 + $0x1], 0  ;;  %s9622_s21 = smov 0   ;;  %s9624_s22 = smov 0  }
   0x3   :  { %s9626_s23 = smov 0   ;;  %s9628_s24 = smov 0  }
   0x4   :  { %s9630_s25 = smov 0   ;;  %s9632_s26 = smov 0  }
   0x5 LB: > { %s6634_s27 = sadd.s32 4294967295, %s9578_s26   ;;  %s6635_s28 = sadd.s32 4294967294, %s9578_s26   ;;  %s9578_s26 = sphi %s9632_s26, %s20_s26   ;;  %s9574_s25 = sphi %s9630_s25, %s12169_s25   ;;  %s9570_s24 = sphi %s9628_s24, %s12168_s24   ;;  %s9566_s23 = sphi %s9626_s23, %s12167_s23   ;;  %s9562_s22 = sphi %s9624_s22, %s12166_s22   ;;  %s9558_s21 = sphi %s9622_s21, %s12165_s21  }
   0x6   : > { %s29_s29 = sadd.s32 1, %s9574_s25  ;;  %s172_s30 = sadd.s32 1, %s9566_s23 }
   0x7   : > { %p30_p0 = scmp.ge.s32.totalorder %s29_s29, 4  ;;  %p182_p1 = scmp.ne.s32.totalorder %s9566_s23, %s9562_s22 }
   0x8   : > { %p183_p2 = scmp.eq.s32.totalorder %s6634_s27, 3  ;;  %p188_p3 = scmp.ne.s32.totalorder %s9562_s22, %s9558_s21 }
   0x9   : > { %s12171_s29 = smov (%p30_p0, %s29_s29), 0  ;;  %p189_p5 = scmp.eq.s32.totalorder %s6635_s28, 3 }
   0xa   : > { %p9662_p4 = por %p183_p2, %p182_p1  ;;  %s168_s8 = ssub.s32 %s9574_s25, %s12171_s29 }
   0xb   : > { %p6636_p6 = scmp.ge.s32.totalorder %s9578_s26, 1  ;;  %p170_p7 = scmp.eq.s32.totalorder %s168_s8, 0 }
   0xc   : > { %s11980_s7 = scalar_select %p9662_p4, 1, 0 }
   0xd   : > { %p9669_p8 = por %p189_p5, %p188_p3  ;;  %p196_p9 = scmp.lt.s32.totalorder %s9578_s26, 5 }
   0xe   : > { %s9675_s10 = scalar_select %p170_p7, %s9566_s23, %s172_s30  }
   0xf   : > { %s11981_s9 = scalar_select %p9669_p8, 1, 0 }
  0x10   : > { %p9677_p10 = pnand %p6636_p6, %p196_p9  ;;  %p9681_p11 = scmp.eq.s32.totalorder %s6634_s27, 0 }
  0x11   : > { %s9580_s13 = smov [#allocation2]   ;;  %s9468_s18 = scalar_lea.hbm %s11844_s1, 2048 }
  0x12   : > { %s11982_s11 = scalar_select %p9677_p10, 1, 0 }
  0x13   : > { %s11983_s12 = scalar_select %p9681_p11, 1, 0 }
  0x14   : > { %p9371_p12 = pneg %p9677_p10  ;;  %s217_s14 = sshll.u32 %s9580_s13, 4  ;;  %s218_s14 = int_to_ptr.vmem [resolvable:$true] %s217_s14 }
  0x15   : > { %p9469_p0 = scmp.ne.s32.totalorder %s11844_s1, %s9468_s18  ;;  %p9475_p5 = scmp.lt.u32.totalorder %s9468_s18, %s11844_s1 }
  0x16   : > { %p9689_p13 = pnand %p9681_p11, %p9371_p12 }
  0x18   : > { %p9470_p1 = pneg %p9689_p13 }
  0x1a   : > { %p9471_p2 = pnand %p9470_p1, %p9469_p0 }
  0x1c   : > { %p9472_p3 = pneg %p9471_p2 }
  0x1e   : > { %p9477_p6 = pnand %p9475_p5, %p9472_p3 }
  0x20   : > { %9480 = shalt.err (!%p9477_p6)
}
  0x21   : > { %s9481_s30 = scalar_lea.vmem %s218_s14, 2048  ;;  %p9489_p8 = scmp.lt.s32.totalorder %s218_s14, %s218_s14 }
  0x22   : > { %p9482_p7 = scmp.ne.s32.totalorder %s218_s14, %s9481_s30  ;;  %p9490_p4 = scmp.lt.s32.totalorder %s9481_s30, %s9481_s30 }
  0x24   : > { %p9484_p9 = pnand %p9482_p7, %p9470_p1  ;;  %p9491_p11 = por %p9490_p4, %p9489_p8 }
  0x26   : > { %p9485_p12 = pneg %p9484_p9 }
  0x28   : > { %p9492_p10 = pnand %p9491_p11, %p9485_p12 }
  0x2a   : > { %9495 = shalt.err (!%p9492_p10)
}
  0x2b   : > { %s9581_s8 = smov 128   ;;  %s9582_s13 = smov 8  }
  0x2c   : > { %9374 = dma.hbm_to_vmem [thread:$0]  (!%p9689_p13), %s11844_s1, 2048, %s218_s14, [#allocation3], %s9581_s8, %s9581_s8, %s9582_s13  }
  0x2d   : > { %p11985_p0 = scmp.ne.s32.totalorder %s11982_s11, 0 }
  0x2f   : > { %245 = sbr.rel (%p11985_p0) target bundleno = 1964 (0x7ac), region = 44 }
  0x36   : > { %p11986_p2 = scmp.ne.s32.totalorder %s11983_s12, 0 }
  0x38   : > { %9549 = dma.done.wait (%p11986_p2), [#allocation3], 2048  }
  0x39   : > { %9551 = vsyncadd (%p11986_p2), [#allocation3], 4294965248  ;;  %s6642_s18 = sshll.u32 %s9570_s24, 5  ;;  %vm304_vm0 = vcmask 261120   ;;  %v282_v7 = vld [vmem:[%s11843_s0] sm:$0xff]  ;;  %v283_v8 = vld [vmem:[%s11843_s0 + $0x8] sm:$0xff] }
  0x3a   : > { %s299_s19 = scalar_lea.vmem [#allocation2], %s6642_s18  ;;  %v306_v10 = vsel %vm304_vm0, %v282_v7, 0  ;;  %v309_v11 = vsel %vm304_vm0, %v283_v8, 0  ;;  %v284_v12 = vld [vmem:[%s11843_s0 + $0x10] sm:$0xff]  ;;  %v285_v13 = vld [vmem:[%s11843_s0 + $0x18] sm:$0xff]  ;;  %v286_v18 = vld [vmem:[%s11843_s0 + $0x20] sm:$0xff] }
  0x3b   : > { %v300_v0 = vld [vmem:[%s299_s19] sm:$0xff]  ;;  %v301_v1 = vld [vmem:[%s299_s19 + $0x8] sm:$0xff]  ;;  %v9716_v2 = vld [vmem:[%s299_s19 + $0x10] sm:$0xff]  ;;  %v9738_v15 = vand.u32 4294901760, %v306_v10  ;;  %v9740_v16 = vand.u32 4294901760, %v309_v11  ;;  %v312_v22 = vsel %vm304_vm0, %v284_v12, 0 }
  0x3c   : > { %v354_v3 = vand.u32 4294901760, %v300_v0  ;;  %v357_v4 = vand.u32 4294901760, %v301_v1  ;;  %v9718_v5 = vld [vmem:[%s299_s19 + $0x18] sm:$0xff]  ;;  %v360_v6 = vand.u32 4294901760, %v9716_v2  ;;  %v287_v19 = vld [vmem:[%s11843_s0 + $0x28] sm:$0xff]  ;;  %v315_v23 = vsel %vm304_vm0, %v285_v13, 0 }
  0x3d   : > { %v363_v9 = vand.u32 4294901760, %v9718_v5  ;;  %v9763_v24 = vsub.f32 %v306_v10, %v9738_v15  ;;  %v9766_v25 = vsub.f32 %v309_v11, %v9740_v16  ;;  %v9769_v27 = vand.u32 4294901760, %v312_v22  ;;  %v288_v40 = vld [vmem:[%s11843_s0 + $0x30] sm:$0xff]  ;;  %v289_v49 = vld [vmem:[%s11843_s0 + $0x38] sm:$0xff]  ;;  %v290_v50 = vld [vmem:[%s11843_s0 + $0x40] sm:$0xff]  ;;  %s272_s16 = sand.u32 1, %s9562_s22  }
  0x3e   : > { %v9736_v14 = vpack.c.bf16 %v357_v4, %v354_v3  ;;  %v9742_v17 = vsub.f32 %v300_v0, %v354_v3  ;;  %v9756_v21 = vsub.f32 %v301_v1, %v357_v4  ;;  %v9774_v29 = vand.u32 4294901760, %v315_v23  ;;  %v291_v59 = vld [vmem:[%s11843_s0 + $0x48] sm:$0xff]  ;;  %v292_v12 = vld [vmem:[%s11843_s0 + $0x50] sm:$0xff]  ;;  %s6641_s19 = sshll.u32 %s272_s16, 7  ;;  %s6646_s15 = sshll.u32 %s9570_s24, 7 }
  0x3f   : > { %v9754_v20 = vpack.c.bf16 %v363_v9, %v360_v6  ;;  %v318_v30 = vsel %vm304_vm0, %v286_v18, 0  ;;  %v321_v31 = vsel %vm304_vm0, %v287_v19, 0  ;;  %v424_v32 = vand.u32 4294901760, %v9763_v24  ;;  %s11728_s12 = scalar_lea.vmem [#allocation5], %s6641_s19  ;;  %s11787_s30 = scalar_lea.hbm %s11849_s6, %s6646_s15 }
  0x40   : > { %8534 = vmatprep.subr.bf16.mxu1 %v9736_v14  ;;  %8558 = vmatprep.subr.bf16.mxu0 %v9736_v14  ;;  %v585_v26 = vand.u32 4294901760, %v9742_v17  ;;  %v592_v28 = vand.u32 4294901760, %v9756_v21  ;;  %v434_v33 = vand.u32 4294901760, %v9766_v25  ;;  %v9784_v35 = vsub.f32 %v312_v22, %v9769_v27  ;;  %s6545_s20 = sshll.u32 %s11728_s12, 4  ;;  %s11797_s24 = scalar_lea.sflag [#allocation4], %s272_s16  ;;  %s11790_s20 = int_to_ptr.vmem [resolvable:$true] %s6545_s20 }
  0x41   : > { %8536 = vmatpush3.bf16.msra.mxu1 %v9736_v14  ;;  %8560 = vmatpush3.bf16.msra.mxu0 %v9736_v14  ;;  %v9788_v38 = vsub.f32 %v315_v23, %v9774_v29  ;;  %v9790_v39 = vand.u32 4294901760, %v318_v30  ;;  %v425_v41 = vsub.f32 %v9763_v24, %v424_v32  ;;  %v9804_v48 = vand.u32 4294901760, %v321_v31  ;;  %s9496_s8 = scalar_lea.vmem %s11790_s20, 2048  ;;  %p12163_p8 = scmp.ne.s32.totalorder %s11980_s7, 0 }
  0x42   : > { %8538 = vmatprep.subr.bf16.mxu1 %v9754_v20  ;;  %8562 = vmatprep.subr.bf16.mxu0 %v9754_v20  ;;  %v586_v34 = vsub.f32 %v9742_v17, %v585_v26  ;;  %v593_v36 = vsub.f32 %v9756_v21, %v592_v28  ;;  %v8565_v37 = vpack.c.bf16 %v592_v28, %v585_v26  ;;  %v444_v44 = vand.u32 4294901760, %v9784_v35  ;;  %v293_v28 = vld [vmem:[%s11843_s0 + $0x58] sm:$0xff]  ;;  %p9497_p4 = scmp.ne.s32.totalorder %s11790_s20, %s9496_s8  ;;  %s9583_s13 = smov [#allocation5]  }
  0x43   : > { %7461 = vmatprep.mubr.f32.mxu0 %v424_v32  ;;  %v435_v42 = vsub.f32 %v9766_v25, %v434_v33  ;;  %v454_v46 = vand.u32 4294901760, %v9788_v38  ;;  %v9802_v47 = vsub.f32 %v318_v30, %v9790_v39  ;;  %v426_v51 = vand.u32 4294901760, %v425_v41  ;;  %s9500_s17 = sshll.u32 %s9583_s13, 4  ;;  %s9501_s17 = int_to_ptr.vmem [resolvable:$false] %s9500_s17 }
  0x44   : > { %v587_v43 = vand.u32 4294901760, %v586_v34  ;;  %v594_v45 = vand.u32 4294901760, %v593_v36  ;;  %v445_v53 = vsub.f32 %v9784_v35, %v444_v44  ;;  %v324_v54 = vsel %vm304_vm0, %v288_v40, 0  ;;  %p9498_p10 = pnand %p9497_p4, %p12163_p8  ;;  %s9502_s18 = scalar_lea.vmem %s9501_s17, 4096 }
  0x45   : > { %8540 = vmatpush3.bf16.msra.mxu1 %v9754_v20  ;;  %8564 = vmatpush3.bf16.msra.mxu0 %v9754_v20  ;;  %v436_v52 = vand.u32 4294901760, %v435_v42  ;;  %v455_v56 = vsub.f32 %v9788_v38, %v454_v46  ;;  %v464_v57 = vand.u32 4294901760, %v9802_v47  ;;  %v9817_v58 = vsub.f32 %v321_v31, %v9804_v48  ;;  %p9503_p13 = scmp.lt.s32.totalorder %s11790_s20, %s9501_s17  ;;  %p9504_p1 = scmp.lt.s32.totalorder %s9502_s18, %s9496_s8 }
  0x46   : > { %8566 = vmatprep.subr.bf16.mxu0 %v8565_v37  ;;  %v8541_v55 = vpack.c.bf16 %v594_v45, %v587_v43  ;;  %7365 = vmatprep.mubr.f32.mxu1 %v426_v51  ;;  %v446_v60 = vand.u32 4294901760, %v445_v53  ;;  %v9822_v61 = vand.u32 4294901760, %v324_v54  ;;  %v327_v62 = vsel %vm304_vm0, %v289_v49, 0  ;;  %v294_v43 = vld [vmem:[%s11843_s0 + $0x60] sm:$0xff]  ;;  %p9499_p11 = pneg %p9498_p10 }
  0x47   : > { %v330_v63 = vsel %vm304_vm0, %v290_v50, 0  ;;  %v456_v0 = vand.u32 4294901760, %v455_v56  ;;  %v465_v1 = vsub.f32 %v9802_v47, %v464_v57  ;;  %v474_v3 = vand.u32 4294901760, %v9817_v58  ;;  %v295_v50 = vld [vmem:[%s11843_s0 + $0x68] sm:$0xff]  ;;  %p9505_p3 = por %p9504_p1, %p9503_p13 }
  0x48   : > { %7462 = vmatmul.mubr.f32.vlgmr.msra.gmra.mrb[0].mxu0 %v434_v33  ;;  %7366 = vmatmul.mubr.f32.vlgmr.msra.gmra.mrb[0].mxu1 %v436_v52  ;;  %v9828_v4 = vand.u32 4294901760, %v327_v62  ;;  %v9831_v7 = vsub.f32 %v324_v54, %v9822_v61  ;;  %v9833_v8 = vand.u32 4294901760, %v330_v63  ;;  %v333_v10 = vsel %vm304_vm0, %v291_v59, 0 }
  0x49   : > { %8542 = vmatprep.subr.bf16.mxu1 %v8541_v55  ;;  %8568 = vmatpush3.bf16.msra.mxu0 %v8565_v37  ;;  %v9839_v11 = vsub.f32 %v9716_v2, %v360_v6  ;;  %v466_v13 = vand.u32 4294901760, %v465_v1  ;;  %v475_v18 = vsub.f32 %v9817_v58, %v474_v3  ;;  %v9848_v22 = vand.u32 4294901760, %v333_v10  ;;  %p9506_p5 = pnand %p9505_p3, %p9499_p11 }
  0x4a   : > { %8544 = vmatpush3.bf16.msra.mxu1 %v8541_v55  ;;  %7368 = vmatprep.mubr.f32.mxu1 %v446_v60  ;;  %v9846_v19 = vsub.f32 %v327_v62, %v9828_v4  ;;  %v484_v23 = vand.u32 4294901760, %v9831_v7  ;;  %v9852_v2 = vsub.f32 %v330_v63, %v9833_v8  ;;  %v9858_v26 = vsub.f32 %v9718_v5, %v363_v9  ;;  %v296_v55 = vld [vmem:[%s11843_s0 + $0x70] sm:$0xff]  ;;  %v297_v62 = vld [vmem:[%s11843_s0 + $0x78] sm:$0xff] }
  0x4b   : > { %7464 = vmatprep.mubr.f32.mxu0 %v444_v44  ;;  %v599_v6 = vand.u32 4294901760, %v9839_v11  ;;  %v476_v30 = vand.u32 4294901760, %v475_v18  ;;  %v9865_v32 = vsub.f32 %v333_v10, %v9848_v22  ;;  %v336_v33 = vsel %vm304_vm0, %v292_v12, 0 }
  0x4c   : > { %7465 = vmatmul.mubr.f32.gmra.mrb[2].mxu0 %v454_v46  ;;  %7369 = vmatmul.mubr.f32.gmra.mrb[2].mxu1 %v456_v0  ;;  %v494_v31 = vand.u32 4294901760, %v9846_v19  ;;  %v485_v34 = vsub.f32 %v9831_v7, %v484_v23  ;;  %v504_v5 = vand.u32 4294901760, %v9852_v2  ;;  %v606_v36 = vand.u32 4294901760, %v9858_v26 }
  0x4d   : > { %7467 = vmatprep.mubr.f32.mxu0 %v464_v57  ;;  %7371 = vmatprep.mubr.f32.mxu1 %v466_v13  ;;  %v600_v9 = vsub.f32 %v9839_v11, %v599_v6  ;;  %v514_v40 = vand.u32 4294901760, %v9865_v32  ;;  %v9874_v41 = vand.u32 4294901760, %v336_v33  ;;  %v339_v42 = vsel %vm304_vm0, %v293_v28, 0 }
  0x4e   : > { %v495_v37 = vsub.f32 %v9846_v19, %v494_v31  ;;  %v486_v44 = vand.u32 4294901760, %v485_v34  ;;  %v505_v45 = vsub.f32 %v9852_v2, %v504_v5  ;;  %v607_v49 = vsub.f32 %v9858_v26, %v606_v36 }
  0x4f   : > { %v601_v46 = vand.u32 4294901760, %v600_v9  ;;  %v515_v52 = vsub.f32 %v9865_v32, %v514_v40  ;;  %v8569_v53 = vpack.c.bf16 %v606_v36, %v599_v6  ;;  %v9887_v54 = vsub.f32 %v336_v33, %v9874_v41 }
  0x50   : > { %7468 = vmatmul.mubr.f32.gmra.mrb[4].mxu0 %v474_v3  ;;  %7372 = vmatmul.mubr.f32.gmra.mrb[4].mxu1 %v476_v30  ;;  %v496_v51 = vand.u32 4294901760, %v495_v37  ;;  %v506_v56 = vand.u32 4294901760, %v505_v45  ;;  %v608_v57 = vand.u32 4294901760, %v607_v49  ;;  %v9892_v59 = vand.u32 4294901760, %v339_v42 }
  0x51   : > { %7470 = vmatprep.mubr.f32.mxu0 %v484_v23  ;;  %7374 = vmatprep.mubr.f32.mxu1 %v486_v44  ;;  %v342_v60 = vsel %vm304_vm0, %v294_v43, 0  ;;  %v516_v63 = vand.u32 4294901760, %v515_v52  ;;  %v524_v0 = vand.u32 4294901760, %v9887_v54  ;;  %v345_v3 = vsel %vm304_vm0, %v295_v50, 0 }
  0x52   : > { %8570 = vmatprep.subr.bf16.mxu0 %v8569_v53  ;;  %v9899_v1 = vand.u32 4294901760, %v342_v60  ;;  %v8545_v10 = vpack.c.bf16 %v608_v57, %v601_v46  ;;  %v9903_v12 = vsub.f32 %v339_v42, %v9892_v59  ;;  %v9905_v13 = vand.u32 4294901760, %v345_v3  ;;  %v9947_v57 = vld [vmem:[%s11845_s2 + $0x8] sm:$0xff] }
  0x53   : > { %v348_v18 = vsel %vm304_vm0, %v296_v55, 0  ;;  %v525_v23 = vsub.f32 %v9887_v54, %v524_v0  ;;  %v351_v30 = vsel %vm304_vm0, %v297_v62, 0  ;;  %8572 = vmatpush3.bf16.msra.mxu0 %v8569_v53  ;;  %vm2851_vm1 = vcmask 1043456  }
  0x54   : > { %7471 = vmatmul.mubr.f32.gmra.mrb[6].mxu0 %v494_v31  ;;  %7375 = vmatmul.mubr.f32.gmra.mrb[6].mxu1 %v496_v51  ;;  %v9910_v6 = vsub.f32 %v342_v60, %v9899_v1  ;;  %v9912_v28 = vand.u32 4294901760, %v348_v18  ;;  %v534_v31 = vand.u32 4294901760, %v9903_v12  ;;  %v9917_v33 = vsub.f32 %v345_v3, %v9905_v13  ;;  %v10009_v3 = vld [vmem:[%s11845_s2 + $0x20] sm:$0xff] }
  0x55   : > { %7473 = vmatprep.mubr.f32.mxu0 %v504_v5  ;;  %7377 = vmatprep.mubr.f32.mxu1 %v506_v56  ;;  %v9919_v34 = vand.u32 4294901760, %v351_v30  ;;  %v8549_v5 = vpack.c.bf16 %v9756_v21, %v9742_v17  ;;  %v526_v9 = vand.u32 4294901760, %v525_v23  ;;  %v9942_v56 = vld [vmem:[%s11845_s2] sm:$0xff]  ;;  %v8553_v60 = vpack.c.bf16 %v9858_v26, %v9839_v11 }
  0x56   : > { %8546 = vmatprep.subr.bf16.mxu1 %v8545_v10  ;;  %v544_v36 = vand.u32 4294901760, %v9910_v6  ;;  %v9925_v37 = vsub.f32 %v348_v18, %v9912_v28  ;;  %v535_v42 = vsub.f32 %v9903_v12, %v534_v31  ;;  %v554_v43 = vand.u32 4294901760, %v9917_v33  ;;  %8574 = vmatprep.subr.bf16.mxu0 %v9736_v14 }
  0x57   : > { %8548 = vmatpush3.bf16.msra.mxu1 %v8545_v10  ;;  %v9930_v44 = vsub.f32 %v351_v30, %v9919_v34  ;;  %v1501_v62 = vand.u32 4294901760, %v9942_v56  ;;  %v10014_v10 = vld [vmem:[%s11845_s2 + $0x28] sm:$0xff]  ;;  %v1513_v23 = vand.u32 4294901760, %v10009_v3  ;;  %vm2802_vm2 = vcmask 31744  }
  0x58   : > { %7474 = vmatmul.mubr.f32.gmra.mrb[8].mxu0 %v514_v40  ;;  %8550 = vmatprep.subr.bf16.mxu1 %v8549_v5  ;;  %v545_v17 = vsub.f32 %v9910_v6, %v544_v36  ;;  %v564_v21 = vand.u32 4294901760, %v9925_v37  ;;  %v536_v45 = vand.u32 4294901760, %v535_v42  ;;  %v555_v46 = vsub.f32 %v9917_v33, %v554_v43 }
  0x59   : > { %7378 = vmatmul.mubr.f32.gmra.mrb[8].mxu1 %v516_v63  ;;  %7476 = vmatprep.mubr.f32.mxu0 %v524_v0  ;;  %v574_v40 = vand.u32 4294901760, %v9930_v44  ;;  %v1504_v63 = vand.u32 4294901760, %v9947_v57  ;;  %v1516_v30 = vand.u32 4294901760, %v10014_v10 }
  0x5a   : > { %7380 = vmatprep.mubr.f32.mxu1 %v526_v9  ;;  %v546_v49 = vand.u32 4294901760, %v545_v17  ;;  %v565_v50 = vsub.f32 %v9925_v37, %v564_v21  ;;  %v556_v51 = vand.u32 4294901760, %v555_v46 }
  0x5b   : > { %v575_v52 = vsub.f32 %v9930_v44, %v574_v40  ;;  %v9964_v11 = vpack.c.bf16 %v1504_v63, %v1501_v62 }
  0x5c   : > { %7477 = vmatmul.mubr.f32.gmra.mrb[10].mxu0 %v534_v31  ;;  %v566_v53 = vand.u32 4294901760, %v565_v50  ;;  %v10031_v31 = vld [vmem:[%s11845_s2 + $0x30] sm:$0xff] }
  0x5d   : > { %7381 = vmatmul.mubr.f32.gmra.mrb[10].mxu1 %v536_v45  ;;  %7479 = vmatprep.mubr.f32.mxu0 %v544_v36  ;;  %v576_v55 = vand.u32 4294901760, %v575_v52 }
  0x5e   : > { %7383 = vmatprep.mubr.f32.mxu1 %v546_v49 }
  0x60   : > { %7480 = vmatmul.mubr.f32.gmra.mrb[12].mxu0 %v554_v43 }
  0x61   : > { %7384 = vmatmul.mubr.f32.gmra.mrb[12].mxu1 %v556_v51  ;;  %7482 = vmatprep.mubr.f32.mxu0 %v564_v21 }
  0x62   : > { %7386 = vmatprep.mubr.f32.mxu1 %v566_v53 }
  0x64   : > { %7483 = vmatmul.mubr.f32.gmra.mrb[14].mxu0 %v574_v40 }
  0x65   : > { %7387 = vmatmul.mubr.f32.gmra.mrb[14].mxu1 %v576_v55  ;;  %7493 = vmatprep.mubr.f32.mxu0 %v9738_v15 }
  0x66   : > { %7397 = vmatprep.mubr.f32.mxu1 %v9738_v15 }
  0x68   : > { %7494 = vmatmul.mubr.f32.vlgmr.msra.gmra.mrb[0].mxu0 %v9740_v16 }
  0x69   : > { %7398 = vmatmul.mubr.f32.vlgmr.msra.gmra.mrb[0].mxu1 %v9740_v16  ;;  %8576 = vmatpush3.bf16.msra.mxu0 %v9736_v14  ;;  %v9993_v14 = vld [vmem:[%s11845_s2 + $0x10] sm:$0xff] }
  0x6a   : > { %8552 = vmatpush3.bf16.msra.mxu1 %v8549_v5  ;;  %7400 = vmatprep.mubr.f32.mxu1 %v9769_v27  ;;  %v1507_v26 = vand.u32 4294901760, %v9993_v14 }
  0x6b   : > { %7496 = vmatprep.mubr.f32.mxu0 %v9769_v27  ;;  %8554 = vmatprep.subr.bf16.mxu1 %v8553_v60 }
  0x6c   : > { %7497 = vmatmul.mubr.f32.gmra.mrb[2].mxu0 %v9774_v29  ;;  %8578 = vmatprep.subr.bf16.mxu0 %v9754_v20 }
  0x6d   : > { %7401 = vmatmul.mubr.f32.gmra.mrb[2].mxu1 %v9774_v29  ;;  %7499 = vmatprep.mubr.f32.mxu0 %v9790_v39 }
  0x6e   : > { %7403 = vmatprep.mubr.f32.mxu1 %v9790_v39  ;;  %8556 = vmatpush3.bf16.msra.mxu1 %v8553_v60 }
  0x6f   : > { %8580 = vmatpush3.bf16.msra.mxu0 %v9754_v20  ;;  %8582 = vmatprep.subr.bf16.mxu1 %v9964_v11  ;;  %v9998_v20 = vld [vmem:[%s11845_s2 + $0x18] sm:$0xff] }
  0x70   : > { %7500 = vmatmul.mubr.f32.gmra.mrb[4].mxu0 %v9804_v48  ;;  %v1510_v0 = vand.u32 4294901760, %v9998_v20 }
  0x71   : > { %7404 = vmatmul.mubr.f32.gmra.mrb[4].mxu1 %v9804_v48  ;;  %7502 = vmatprep.mubr.f32.mxu0 %v9822_v61 }
  0x72   : > { %7406 = vmatprep.mubr.f32.mxu1 %v9822_v61  ;;  %v10023_v18 = vpack.c.bf16 %v1510_v0, %v1507_v26 }
  0x74   : > { %7503 = vmatmul.mubr.f32.gmra.mrb[6].mxu0 %v9828_v4 }
  0x75   : > { %7407 = vmatmul.mubr.f32.gmra.mrb[6].mxu1 %v9828_v4  ;;  %7505 = vmatprep.mubr.f32.mxu0 %v9833_v8 }
  0x76   : > { %7409 = vmatprep.mubr.f32.mxu1 %v9833_v8 }
  0x78   : > { %7506 = vmatmul.mubr.f32.gmra.mrb[8].mxu0 %v9848_v22 }
  0x79   : > { %7410 = vmatmul.mubr.f32.gmra.mrb[8].mxu1 %v9848_v22  ;;  %7508 = vmatprep.mubr.f32.mxu0 %v9874_v41 }
  0x7a   : > { %7412 = vmatprep.mubr.f32.mxu1 %v9874_v41 }
  0x7c   : > { %7509 = vmatmul.mubr.f32.gmra.mrb[10].mxu0 %v9892_v59 }
  0x7d   : > { %7413 = vmatmul.mubr.f32.gmra.mrb[10].mxu1 %v9892_v59  ;;  %7511 = vmatprep.mubr.f32.mxu0 %v9899_v1 }
  0x7e   : > { %7415 = vmatprep.mubr.f32.mxu1 %v9899_v1 }
  0x80   : > { %7512 = vmatmul.mubr.f32.gmra.mrb[12].mxu0 %v9905_v13 }
  0x81   : > { %7416 = vmatmul.mubr.f32.gmra.mrb[12].mxu1 %v9905_v13  ;;  %7514 = vmatprep.mubr.f32.mxu0 %v9912_v28 }
  0x82   : > { %7418 = vmatprep.mubr.f32.mxu1 %v9912_v28 }
  0x84   : > { %7515 = vmatmul.mubr.f32.gmra.mrb[14].mxu0 %v9919_v34 }
  0x85   : > { %7419 = vmatmul.mubr.f32.gmra.mrb[14].mxu1 %v9919_v34  ;;  %7525 = vmatprep.mubr.f32.mxu0 %v9738_v15  ;;  %v10036_v15 = vld [vmem:[%s11845_s2 + $0x38] sm:$0xff] }
  0x86   : > { %7429 = vmatprep.mubr.f32.mxu1 %v9763_v24  ;;  %v1519_v24 = vand.u32 4294901760, %v10031_v31  ;;  %v1522_v5 = vand.u32 4294901760, %v10036_v15 }
  0x88   : > { %7526 = vmatmul.mubr.f32.vlgmr.msra.gmra.mrb[0].mxu0 %v9740_v16  ;;  %v10047_v16 = vpack.c.bf16 %v1516_v30, %v1513_v23 }
  0x89   : > { %7430 = vmatmul.mubr.f32.vlgmr.msra.gmra.mrb[0].mxu1 %v9766_v25  ;;  %7528 = vmatprep.mubr.f32.mxu0 %v9769_v27  ;;  %v10055_v25 = vld [vmem:[%s11845_s2 + $0x40] sm:$0xff]  ;;  %v10060_v27 = vld [vmem:[%s11845_s2 + $0x48] sm:$0xff] }
  0x8a   : > { %7432 = vmatprep.mubr.f32.mxu1 %v9784_v35  ;;  %8584 = vmatpush3.bf16.msra.mxu1 %v9964_v11  ;;  %v1525_v35 = vand.u32 4294901760, %v10055_v25  ;;  %v1528_v9 = vand.u32 4294901760, %v10060_v27 }
  0x8b   : > { %8586 = vmatprep.subr.bf16.mxu1 %v10023_v18 }
  0x8c   : > { %7529 = vmatmul.mubr.f32.gmra.mrb[2].mxu0 %v9774_v29  ;;  %v10071_v29 = vpack.c.bf16 %v1522_v5, %v1519_v24 }
  0x8d   : > { %7433 = vmatmul.mubr.f32.gmra.mrb[2].mxu1 %v9788_v38  ;;  %7531 = vmatprep.mubr.f32.mxu0 %v9790_v39  ;;  %v10085_v38 = vpack.c.bf16 %v1528_v9, %v1525_v35  ;;  %v1493_v39 = vld [vmem:[%s11845_s2 + $0x50] sm:$0xff] }
  0x8e   : > { %7435 = vmatprep.mubr.f32.mxu1 %v9802_v47  ;;  %8588 = vmatpush3.bf16.msra.mxu1 %v10023_v18  ;;  %v1494_v47 = vld [vmem:[%s11845_s2 + $0x58] sm:$0xff] }
  0x8f   : > { %8590 = vmatprep.subr.bf16.mxu1 %v10047_v16 }
  0x90   : > { %7532 = vmatmul.mubr.f32.gmra.mrb[4].mxu0 %v9804_v48  ;;  %v1531_v48 = vand.u32 4294901760, %v1493_v39 }
  0x91   : > { %7436 = vmatmul.mubr.f32.gmra.mrb[4].mxu1 %v9817_v58  ;;  %7534 = vmatprep.mubr.f32.mxu0 %v9822_v61  ;;  %v1534_v58 = vand.u32 4294901760, %v1494_v47 }
  0x92   : > { %7438 = vmatprep.mubr.f32.mxu1 %v9831_v7  ;;  %8592 = vmatpush3.bf16.msra.mxu1 %v10047_v16  ;;  %v1496_v7 = vld [vmem:[%s11845_s2 + $0x68] sm:$0xff]  ;;  %v10159_v42 = vsub.f32 %v1493_v39, %v1531_v48 }
  0x93   : > { %8594 = vmatprep.subr.bf16.mxu1 %v10071_v29  ;;  %v10114_v61 = vpack.c.bf16 %v1534_v58, %v1531_v48  ;;  %v10161_v43 = vsub.f32 %v1494_v47, %v1534_v58 }
  0x94   : > { %7535 = vmatmul.mubr.f32.gmra.mrb[6].mxu0 %v9828_v4  ;;  %v1495_v4 = vld [vmem:[%s11845_s2 + $0x60] sm:$0xff]  ;;  %11992 = vst [vmem:[#allocation13_spill] sm:$0xff] %v10159_v42 }
  0x95   : > { %7439 = vmatmul.mubr.f32.gmra.mrb[6].mxu1 %v9846_v19  ;;  %7537 = vmatprep.mubr.f32.mxu0 %v9833_v8  ;;  %v1537_v8 = vand.u32 4294901760, %v1495_v4  ;;  %v1540_v19 = vand.u32 4294901760, %v1496_v7  ;;  %11993 = vst [vmem:[#allocation14_spill] sm:$0xff] %v10161_v43  ;;  %v11858_v17 = vand.u32 4294901760, %v10161_v43 }
  0x96   : > { %7441 = vmatprep.mubr.f32.mxu1 %v9852_v2  ;;  %8596 = vmatpush3.bf16.msra.mxu1 %v10071_v29  ;;  %v10129_v2 = vsub.f32 %v9942_v56, %v1501_v62 }
  0x97   : > { %8598 = vmatprep.subr.bf16.mxu1 %v10085_v38  ;;  %v1822_v45 = vsub.f32 %v10161_v43, %v11858_v17  ;;  %v10171_v46 = vsub.f32 %v1495_v4, %v1537_v8  ;;  %v10173_v40 = vsub.f32 %v1496_v7, %v1540_v19 }
  0x98   : > { %7538 = vmatmul.mubr.f32.gmra.mrb[8].mxu0 %v9848_v22  ;;  %v10124_v22 = vpack.c.bf16 %v1540_v19, %v1537_v8  ;;  %11988 = vst [vmem:[#allocation9_spill] sm:$0xff] %v10129_v2 }
  0x99   : > { %7442 = vmatmul.mubr.f32.gmra.mrb[8].mxu1 %v9865_v32  ;;  %7540 = vmatprep.mubr.f32.mxu0 %v9874_v41  ;;  %v10134_v32 = vsub.f32 %v9947_v57, %v1504_v63  ;;  %v1497_v41 = vld [vmem:[%s11845_s2 + $0x70] sm:$0xff]  ;;  %11994 = vst [vmem:[#allocation15_spill] sm:$0xff] %v10171_v46  ;;  %11995 = vst [vmem:[#allocation16_spill] sm:$0xff] %v10173_v40  ;;  %v1823_v50 = vand.u32 4294901760, %v1822_v45  ;;  %v11857_v51 = vand.u32 4294901760, %v10171_v46  ;;  %v11856_v52 = vand.u32 4294901760, %v10173_v40 }
  0x9a   : > { %7444 = vmatprep.mubr.f32.mxu1 %v9887_v54  ;;  %8600 = vmatpush3.bf16.msra.mxu1 %v10085_v38  ;;  %11987 = vst [vmem:[#allocation8_spill] sm:$0xff] %v10124_v22  ;;  %v1498_v54 = vld [vmem:[%s11845_s2 + $0x78] sm:$0xff] }
  0x9b   : > { %8602 = vmatprep.subr.bf16.mxu1 %v10114_v61  ;;  %11989 = vst [vmem:[#allocation10_spill] sm:$0xff] %v10134_v32  ;;  %v1829_v55 = vsub.f32 %v10171_v46, %v11857_v51  ;;  %v1836_v56 = vsub.f32 %v10173_v40, %v11856_v52 }
  0x9c   : > { %7541 = vmatmul.mubr.f32.gmra.mrb[10].mxu0 %v9892_v59  ;;  %v1543_v59 = vand.u32 4294901760, %v1497_v41 }
  0x9d   : > { %7445 = vmatmul.mubr.f32.gmra.mrb[10].mxu1 %v9903_v12  ;;  %7543 = vmatprep.mubr.f32.mxu0 %v9899_v1  ;;  %v1546_v1 = vand.u32 4294901760, %v1498_v54  ;;  %v11868_v12 = vand.u32 4294901760, %v10129_v2  ;;  %v1830_v62 = vand.u32 4294901760, %v1829_v55  ;;  %v1837_v63 = vand.u32 4294901760, %v1836_v56 }
  0x9e   : > { %7447 = vmatprep.mubr.f32.mxu1 %v9910_v6  ;;  %8604 = vmatpush3.bf16.msra.mxu1 %v10114_v61  ;;  %v10185_v57 = vsub.f32 %v1497_v41, %v1543_v59  ;;  %v10203_v41 = vpack.c.bf16 %v10134_v32, %v10129_v2 }
  0x9f   : > { %8606 = vmatprep.subr.bf16.mxu1 %v10124_v22  ;;  %v10146_v6 = vpack.c.bf16 %v1546_v1, %v1543_v59  ;;  %v10187_v60 = vsub.f32 %v1498_v54, %v1546_v1  ;;  %v10191_v48 = vpack.c.bf16 %v1837_v63, %v1830_v62  ;;  %v10207_v54 = vpack.c.bf16 %v10161_v43, %v10159_v42 }
  0xa0   : > { %7544 = vmatmul.mubr.f32.gmra.mrb[12].mxu0 %v9905_v13  ;;  %v11867_v13 = vand.u32 4294901760, %v10134_v32  ;;  %11996 = vst [vmem:[#allocation17_spill] sm:$0xff] %v10185_v57  ;;  %v11855_v39 = vand.u32 4294901760, %v10185_v57  ;;  %v10211_v59 = vpack.c.bf16 %v10173_v40, %v10171_v46  ;;  %v10260_v62 = vsub.f32 %v10031_v31, %v1519_v24 }
  0xa1   : > { %7448 = vmatmul.mubr.f32.gmra.mrb[12].mxu1 %v9917_v33  ;;  %7546 = vmatprep.mubr.f32.mxu0 %v9912_v28  ;;  %11990 = vst [vmem:[#allocation11_spill] sm:$0xff] %v10146_v6  ;;  %v1745_v28 = vsub.f32 %v10129_v2, %v11868_v12  ;;  %11997 = vst [vmem:[#allocation18_spill] sm:$0xff] %v10187_v60  ;;  %v11854_v47 = vand.u32 4294901760, %v10187_v60  ;;  %v10215_v1 = vpack.c.bf16 %v10187_v60, %v10185_v57 }
  0xa2   : > { %7450 = vmatprep.mubr.f32.mxu1 %v9925_v37  ;;  %8608 = vmatpush3.bf16.msra.mxu1 %v10124_v22  ;;  %v1752_v33 = vsub.f32 %v10134_v32, %v11867_v13  ;;  %v1843_v58 = vsub.f32 %v10185_v57, %v11855_v39  ;;  %11998 = vst [vmem:[#allocation19_spill] sm:$0xff] %v10207_v54  ;;  %11999 = vst [vmem:[#allocation20_spill] sm:$0xff] %v10211_v59  ;;  %v11866_v52 = vand.u32 4294901760, %v10260_v62 }
  0xa3   : > { %8610 = vmatprep.subr.bf16.mxu1 %v10146_v6  ;;  %v1850_v4 = vsub.f32 %v10187_v60, %v11854_v47  ;;  %12000 = vst [vmem:[#allocation21_spill] sm:$0xff] %v10215_v1 }
  0xa4   : > { %7547 = vmatmul.mubr.f32.gmra.mrb[14].mxu0 %v9919_v34  ;;  %v1746_v34 = vand.u32 4294901760, %v1745_v28  ;;  %v1753_v36 = vand.u32 4294901760, %v1752_v33  ;;  %v1844_v7 = vand.u32 4294901760, %v1843_v58  ;;  %v10220_v28 = vsub.f32 %v9993_v14, %v1507_v26 }
  0xa5   : > { %7451 = vmatmul.mubr.f32.gmra.mrb[14].mxu1 %v9930_v44  ;;  %v11859_v44 = vand.u32 4294901760, %v10159_v42  ;;  %v1851_v8 = vand.u32 4294901760, %v1850_v4  ;;  %v10225_v33 = vsub.f32 %v9998_v20, %v1510_v0  ;;  %v10268_v4 = vsub.f32 %v10036_v15, %v1522_v5 }
  0xa6   : > { %8612 = vmatpush3.bf16.msra.mxu1 %v10146_v6  ;;  %v10156_v37 = vpack.c.bf16 %v1753_v36, %v1746_v34  ;;  %v10230_v34 = vsub.f32 %v10009_v3, %v1513_v23  ;;  %v10235_v36 = vsub.f32 %v10014_v10, %v1516_v30 }
  0xa7   : > { %v1815_v21 = vsub.f32 %v10159_v42, %v11859_v44  ;;  %v10199_v19 = vpack.c.bf16 %v1851_v8, %v1844_v7  ;;  %v11862_v14 = vand.u32 4294901760, %v10225_v33  ;;  %v10305_v44 = vsub.f32 %v10060_v27, %v1528_v9 }
  0xa8   : > { %11991 = vst [vmem:[#allocation12_spill] sm:$0xff] %v10156_v37  ;;  %8614 = vmatprep.subr.bf16.mxu1 %v10156_v37  ;;  %v11861_v26 = vand.u32 4294901760, %v10230_v34  ;;  %v11860_v45 = vand.u32 4294901760, %v10235_v36  ;;  %v1787_v9 = vsub.f32 %v10260_v62, %v11866_v52 }
  0xa9   : > { %v1816_v49 = vand.u32 4294901760, %v1815_v21  ;;  %v11864_v21 = vand.u32 4294901760, %v10220_v28  ;;  %v1766_v10 = vsub.f32 %v10225_v33, %v11862_v14 }
  0xaa   : > { %v1780_v55 = vsub.f32 %v10235_v36, %v11860_v45  ;;  %v1788_v13 = vand.u32 4294901760, %v1787_v9 }
  0xab   : > { %v10177_v53 = vpack.c.bf16 %v1823_v50, %v1816_v49  ;;  %v1759_v3 = vsub.f32 %v10220_v28, %v11864_v21  ;;  %v1773_v50 = vsub.f32 %v10230_v34, %v11861_v26 }
  0xac   : > { %v1781_v39 = vand.u32 4294901760, %v1780_v55 }
  0xad   : > { %v1774_v47 = vand.u32 4294901760, %v1773_v50  ;;  %v10294_v50 = vsub.f32 %v10055_v25, %v1525_v35 }
  0xaf   : > { %v10316_v14 = vpack.c.bf16 %v1781_v39, %v1774_v47 }
  0xb1   : > { %12007 = vst [vmem:[#allocation28_spill] sm:$0xff] %v10316_v14 }
 0x15b   : > { %v7527_v20 = vpop.f32.mrb[0].mxu0 }
 0x15c   : > { %v7431_v0 = vpop.f32.mrb[0].mxu1  ;;  %v1389_v49 = vpop.f32.mrb[1].mxu0 }
 0x15d   : > { %v10247_v23 = vadd.f32 %v7527_v20, %v7431_v0  ;;  %v839_v30 = vpop.f32.mrb[1].mxu1  ;;  %v1760_v0 = vand.u32 4294901760, %v1759_v3 }
 0x15e   : > { %v10255_v56 = vadd.f32 %v1389_v49, %v839_v30  ;;  %v1767_v49 = vand.u32 4294901760, %v1766_v10 }
 0x15f   : > { %12001 = vst [vmem:[#allocation22_spill] sm:$0xff] %v10247_v23  ;;  %v10263_v63 = vand.u32 4294901760, %v10247_v23  ;;  %v7530_v58 = vpop.f32.mrb[2].mxu0 }
 0x160   : > { %12002 = vst [vmem:[#allocation23_spill] sm:$0xff] %v10255_v56  ;;  %v10271_v7 = vand.u32 4294901760, %v10255_v56  ;;  %v7434_v8 = vpop.f32.mrb[2].mxu1  ;;  %v1401_v20 = vpop.f32.mrb[3].mxu0  ;;  %v10300_v17 = vpack.c.bf16 %v1767_v49, %v1760_v0 }
 0x161   : > { %v10275_v31 = vsub.f32 %v10247_v23, %v10263_v63  ;;  %v10277_v24 = vadd.f32 %v7530_v58, %v7434_v8  ;;  %v853_v30 = vpop.f32.mrb[3].mxu1  ;;  %v11870_v58 = vand.u32 4294901760, %v10268_v4  ;;  %v12012_v23 = vand.u32 4294901760, %v10294_v50 }
 0x162   : > { %v10281_v15 = vsub.f32 %v10255_v56, %v10271_v7  ;;  %v10283_v5 = vadd.f32 %v1401_v20, %v853_v30  ;;  %12005 = vst [vmem:[#allocation26_spill] sm:$0xff] %v10300_v17 }
 0x163   : > { %12003 = vst [vmem:[#allocation24_spill] sm:$0xff] %v10277_v24  ;;  %v11863_v3 = vand.u32 4294901760, %v10275_v31  ;;  %v10288_v10 = vand.u32 4294901760, %v10277_v24  ;;  %v7533_v51 = vpop.f32.mrb[4].mxu0  ;;  %v1794_v47 = vsub.f32 %v10268_v4, %v11870_v58 }
 0x164   : > { %12004 = vst [vmem:[#allocation25_spill] sm:$0xff] %v10283_v5  ;;  %v10297_v55 = vand.u32 4294901760, %v10283_v5  ;;  %v7437_v8 = vpop.f32.mrb[4].mxu1  ;;  %v1413_v20 = vpop.f32.mrb[5].mxu0  ;;  %v11865_v30 = vand.u32 4294901760, %v10281_v15 }
 0x165   : > { %v1594_v45 = vsub.f32 %v10275_v31, %v11863_v3  ;;  %v10312_v25 = vsub.f32 %v10277_v24, %v10288_v10  ;;  %v10314_v35 = vadd.f32 %v7533_v51, %v7437_v8  ;;  %v867_v26 = vpop.f32.mrb[5].mxu1 }
 0x166   : > { %v10320_v0 = vsub.f32 %v10283_v5, %v10297_v55  ;;  %v10322_v49 = vadd.f32 %v1413_v20, %v867_v26  ;;  %v1584_v27 = vsub.f32 %v10281_v15, %v11865_v30 }
 0x167   : > { %12006 = vst [vmem:[#allocation27_spill] sm:$0xff] %v10314_v35  ;;  %v10331_v51 = vand.u32 4294901760, %v10314_v35  ;;  %v7536_v8 = vpop.f32.mrb[6].mxu0  ;;  %v1595_v12 = vand.u32 4294901760, %v1594_v45  ;;  %v12010_v26 = vand.u32 4294901760, %v10312_v25 }
 0x168   : > { %12008 = vst [vmem:[#allocation29_spill] sm:$0xff] %v10322_v49  ;;  %v10339_v20 = vand.u32 4294901760, %v10322_v49  ;;  %v7440_v3 = vpop.f32.mrb[6].mxu1  ;;  %v1425_v21 = vpop.f32.mrb[7].mxu0  ;;  %v1585_v30 = vand.u32 4294901760, %v1584_v27  ;;  %v11876_v52 = vand.u32 4294901760, %v10320_v0 }
 0x169   : > { %v10345_v39 = vsub.f32 %v10314_v35, %v10331_v51  ;;  %v10347_v5 = vadd.f32 %v7536_v8, %v7440_v3  ;;  %v881_v58 = vpop.f32.mrb[7].mxu1  ;;  %v1614_v24 = vsub.f32 %v10312_v25, %v12010_v26  ;;  %v1795_v26 = vand.u32 4294901760, %v1794_v47 }
 0x16a   : > { %v10354_v56 = vsub.f32 %v10322_v49, %v10339_v20  ;;  %v10356_v27 = vadd.f32 %v1425_v21, %v881_v58  ;;  %7581 = vmatprep.mubr.f32.mxu1 %v1585_v30  ;;  %v1604_v45 = vsub.f32 %v10320_v0, %v11876_v52  ;;  %v1801_v49 = vsub.f32 %v10294_v50, %v12012_v23 }
 0x16b   : > { %12009 = vst [vmem:[#allocation30_spill] sm:$0xff] %v10347_v5  ;;  %v10362_v3 = vand.u32 4294901760, %v10347_v5  ;;  %7582 = vmatmul.mubr.f32.vlgmr.msra.gmra.mrb[16].mxu1 %v1595_v12  ;;  %v7539_v8 = vpop.f32.mrb[8].mxu0  ;;  %v12013_v12 = vand.u32 4294901760, %v10305_v44  ;;  %v1615_v57 = vand.u32 4294901760, %v1614_v24  ;;  %v10399_v46 = vpack.c.bf16 %v1795_v26, %v1788_v13 }
 0x16c   : > { %12011 = vst [vmem:[#allocation31_spill] sm:$0xff] %v10356_v27  ;;  %v10369_v21 = vand.u32 4294901760, %v10356_v27  ;;  %v7443_v58 = vpop.f32.mrb[8].mxu1  ;;  %8616 = vmatpush3.bf16.msra.mxu1 %v10156_v37  ;;  %v1437_v30 = vpop.f32.mrb[9].mxu0  ;;  %v1605_v9 = vand.u32 4294901760, %v1604_v45  ;;  %v12015_v37 = vand.u32 4294901760, %v10345_v39 }
 0x16d   : > { %v1808_v60 = vsub.f32 %v10305_v44, %v12013_v12  ;;  %v10378_v47 = vsub.f32 %v10347_v5, %v10362_v3  ;;  %v10380_v35 = vadd.f32 %v7539_v8, %v7443_v58  ;;  %v895_v23 = vpop.f32.mrb[9].mxu1  ;;  %8618 = vmatprep.subr.bf16.mxu1 %v10300_v17  ;;  %v12017_v12 = vand.u32 4294901760, %v10354_v56  ;;  %12018 = vst [vmem:[#allocation34_spill] sm:$0xff] %v10399_v46 }
 0x16e   : > { %v1634_v45 = vsub.f32 %v10345_v39, %v12015_v37  ;;  %v10388_v52 = vsub.f32 %v10356_v27, %v10369_v21  ;;  %v10390_v40 = vadd.f32 %v1437_v30, %v895_v23  ;;  %7584 = vmatprep.mubr.f32.mxu1 %v1605_v9  ;;  %v1802_v37 = vand.u32 4294901760, %v1801_v49 }
 0x16f   : > { %12014 = vst [vmem:[#allocation32_spill] sm:$0xff] %v10380_v35  ;;  %v1624_v8 = vsub.f32 %v10354_v56, %v12017_v12  ;;  %v10396_v58 = vand.u32 4294901760, %v10380_v35  ;;  %7585 = vmatmul.mubr.f32.gmra.mrb[18].mxu1 %v1615_v57  ;;  %v7542_v24 = vpop.f32.mrb[10].mxu0  ;;  %v11889_v5 = vand.u32 4294901760, %v10378_v47  ;;  %v1809_v43 = vand.u32 4294901760, %v1808_v60 }
 0x170   : > { %12016 = vst [vmem:[#allocation33_spill] sm:$0xff] %v10390_v40  ;;  %v10402_v27 = vand.u32 4294901760, %v10390_v40  ;;  %v7446_v30 = vpop.f32.mrb[10].mxu1  ;;  %8620 = vmatpush3.bf16.msra.mxu1 %v10300_v17  ;;  %v1449_v9 = vpop.f32.mrb[11].mxu0  ;;  %v1635_v26 = vand.u32 4294901760, %v1634_v45  ;;  %v12021_v60 = vand.u32 4294901760, %v10388_v52 }
 0x171   : > { %v1625_v23 = vand.u32 4294901760, %v1624_v8  ;;  %v10408_v57 = vsub.f32 %v10380_v35, %v10396_v58  ;;  %v10410_v42 = vadd.f32 %v7542_v24, %v7446_v30  ;;  %v909_v13 = vpop.f32.mrb[11].mxu1  ;;  %8622 = vmatprep.subr.bf16.mxu1 %v10316_v14  ;;  %v1654_v49 = vsub.f32 %v10378_v47, %v11889_v5 }
 0x172   : > { %v10418_v8 = vsub.f32 %v10390_v40, %v10402_v27  ;;  %v10420_v12 = vadd.f32 %v1449_v9, %v909_v13  ;;  %v1644_v24 = vsub.f32 %v10388_v52, %v12021_v60  ;;  %v10434_v40 = vpack.c.bf16 %v1809_v43, %v1802_v37 }
 0x173   : > { %12019 = vst [vmem:[#allocation35_spill] sm:$0xff] %v10410_v42  ;;  %7587 = vmatprep.mubr.f32.mxu1 %v1625_v23  ;;  %v10426_v30 = vand.u32 4294901760, %v10410_v42  ;;  %v7545_v45 = vpop.f32.mrb[12].mxu0  ;;  %v1655_v17 = vand.u32 4294901760, %v1654_v49  ;;  %v12024_v2 = vand.u32 4294901760, %v10408_v57 }
 0x174   : > { %12020 = vst [vmem:[#allocation36_spill] sm:$0xff] %v10420_v12  ;;  %7588 = vmatmul.mubr.f32.gmra.mrb[20].mxu1 %v1635_v26  ;;  %v10430_v5 = vand.u32 4294901760, %v10420_v12  ;;  %v7449_v35 = vpop.f32.mrb[12].mxu1  ;;  %v1461_v9 = vpop.f32.mrb[13].mxu0  ;;  %v1645_v13 = vand.u32 4294901760, %v1644_v24  ;;  %v11897_v23 = vand.u32 4294901760, %v10418_v8 }
 0x175   : > { %8624 = vmatpush3.bf16.msra.mxu1 %v10316_v14  ;;  %12022 = vst [vmem:[#allocation37_spill] sm:$0xff] %v10434_v40  ;;  %v10438_v60 = vsub.f32 %v10410_v42, %v10426_v30  ;;  %v10440_v26 = vadd.f32 %v7545_v45, %v7449_v35  ;;  %v923_v32 = vpop.f32.mrb[13].mxu1  ;;  %v1674_v14 = vsub.f32 %v10408_v57, %v12024_v2 }
 0x176   : > { %8626 = vmatprep.subr.bf16.mxu1 %v10399_v46  ;;  %v10448_v24 = vsub.f32 %v10420_v12, %v10430_v5  ;;  %v10450_v43 = vadd.f32 %v1461_v9, %v923_v32  ;;  %7590 = vmatprep.mubr.f32.mxu1 %v1645_v13  ;;  %v1664_v35 = vsub.f32 %v10418_v8, %v11897_v23 }
 0x177   : > { %12023 = vst [vmem:[#allocation38_spill] sm:$0xff] %v10440_v26  ;;  %v10456_v37 = vand.u32 4294901760, %v10440_v26  ;;  %v7548_v49 = vpop.f32.mrb[14].mxu0  ;;  %v11906_v45 = vand.u32 4294901760, %v10438_v60  ;;  %v1675_v6 = vand.u32 4294901760, %v1674_v14 }
 0x178   : > { %12025 = vst [vmem:[#allocation39_spill] sm:$0xff] %v10450_v43  ;;  %7591 = vmatmul.mubr.f32.gmra.mrb[22].mxu1 %v1655_v17  ;;  %v10460_v2 = vand.u32 4294901760, %v10450_v43  ;;  %v7452_v42 = vpop.f32.mrb[14].mxu1  ;;  %v1473_v32 = vpop.f32.mrb[15].mxu0  ;;  %v1665_v9 = vand.u32 4294901760, %v1664_v35  ;;  %v11907_v13 = vand.u32 4294901760, %v10448_v24 }
 0x179   : > { %8628 = vmatpush3.bf16.msra.mxu1 %v10399_v46  ;;  %v10466_v23 = vsub.f32 %v10440_v26, %v10456_v37  ;;  %v10468_v12 = vadd.f32 %v7548_v49, %v7452_v42  ;;  %v937_v17 = vpop.f32.mrb[15].mxu1  ;;  %v1694_v22 = vsub.f32 %v10438_v60, %v11906_v45 }
 0x17a   : > { %8630 = vmatprep.subr.bf16.mxu1 %v10434_v40  ;;  %v10476_v46 = vsub.f32 %v10450_v43, %v10460_v2  ;;  %v10478_v35 = vadd.f32 %v1473_v32, %v937_v17  ;;  %7593 = vmatprep.mubr.f32.mxu1 %v1665_v9  ;;  %v1684_v42 = vsub.f32 %v10448_v24, %v11907_v13 }
 0x17b   : > { %12026 = vst [vmem:[#allocation40_spill] sm:$0xff] %v10468_v12  ;;  %v10484_v49 = vand.u32 4294901760, %v10468_v12  ;;  %v11912_v14 = vand.u32 4294901760, %v10466_v23  ;;  %v1695_v17 = vand.u32 4294901760, %v1694_v22 }
 0x17c   : > { %7594 = vmatmul.mubr.f32.gmra.mrb[24].mxu1 %v1675_v6  ;;  %v10488_v26 = vand.u32 4294901760, %v10478_v35  ;;  %v1685_v45 = vand.u32 4294901760, %v1684_v42  ;;  %v11913_v32 = vand.u32 4294901760, %v10476_v46 }
 0x17d   : > { %8632 = vmatpush3.bf16.msra.mxu1 %v10434_v40  ;;  %v10494_v9 = vsub.f32 %v10468_v12, %v10484_v49  ;;  %v1714_v6 = vsub.f32 %v10466_v23, %v11912_v14 }
 0x17e   : > { %8634 = vmatprep.subr.bf16.mxu1 %v10177_v53  ;;  %v10502_v13 = vsub.f32 %v10478_v35, %v10488_v26  ;;  %7596 = vmatprep.mubr.f32.mxu1 %v1685_v45  ;;  %v1704_v42 = vsub.f32 %v10476_v46, %v11913_v32 }
 0x17f   : > { %v11914_v40 = vand.u32 4294901760, %v10494_v9  ;;  %v1715_v43 = vand.u32 4294901760, %v1714_v6  ;;  %v10524_v6 = vpack.c.bf16 %v10225_v33, %v10220_v28 }
 0x180   : > { %7597 = vmatmul.mubr.f32.gmra.mrb[26].mxu1 %v1695_v17  ;;  %v1705_v22 = vand.u32 4294901760, %v1704_v42  ;;  %v11915_v12 = vand.u32 4294901760, %v10502_v13  ;;  %v1499_v42 = vld [vmem:[%s11846_s3] sm:$0xf] }
 0x181   : > { %8636 = vmatpush3.bf16.msra.mxu1 %v10177_v53  ;;  %v1734_v14 = vsub.f32 %v10494_v9, %v11914_v40  ;;  %12027 = vst [vmem:[#allocation41_spill] sm:$0xff] %v10524_v6  ;;  %v12033_v40 = vld [vmem:[#allocation9_spill] sm:$0xff] }
 0x182   : > { %8638 = vmatprep.subr.bf16.mxu1 %v10191_v48  ;;  %7599 = vmatprep.mubr.f32.mxu1 %v1705_v22  ;;  %v1724_v45 = vsub.f32 %v10502_v13, %v11915_v12  ;;  %v10572_v22 = vsel %vm2851_vm1, %v1499_v42, 0  ;;  %v12032_v42 = vld [vmem:[#allocation11_spill] sm:$0xff]  ;;  %v12034_v12 = vand.u32 4294901760, %v12033_v40  ;;  %v12040_v40 = vand.u32 4294901760, %v10275_v31 }
 0x183   : > { %v1735_v32 = vand.u32 4294901760, %v1734_v14  ;;  %v10540_v14 = vpack.c.bf16 %v10268_v4, %v10260_v62 }
 0x184   : > { %7600 = vmatmul.mubr.f32.gmra.mrb[28].mxu1 %v1715_v43  ;;  %v1725_v17 = vand.u32 4294901760, %v1724_v45  ;;  %v10532_v43 = vpack.c.bf16 %v10235_v36, %v10230_v34  ;;  %v10576_v45 = vand.u32 4294901760, %v10572_v22 }
 0x185   : > { %8640 = vmatpush3.bf16.msra.mxu1 %v10191_v48  ;;  %12029 = vst [vmem:[#allocation43_spill] sm:$0xff] %v10540_v14 }
 0x186   : > { %8642 = vmatprep.subr.bf16.mxu1 %v10199_v19  ;;  %7602 = vmatprep.mubr.f32.mxu1 %v1725_v17  ;;  %12028 = vst [vmem:[#allocation42_spill] sm:$0xff] %v10532_v43  ;;  %v12031_v17 = vld [vmem:[#allocation8_spill] sm:$0xff] }
 0x187   : > { %7885 = vmatprep.subr.mxu0 %v10576_v45 }
 0x188   : > { %7603 = vmatmul.mubr.f32.gmra.mrb[30].mxu1 %v1735_v32  ;;  %v10548_v32 = vpack.c.bf16 %v10305_v44, %v10294_v50  ;;  %7886 = vmatpush3.msra.mxu0 %v10576_v45 }
 0x189   : > { %8644 = vmatpush3.bf16.msra.mxu1 %v10199_v19  ;;  %7637 = vmatprep.mubr.f32.mxu1 %v10271_v7 }
 0x18a   : > { %8646 = vmatprep.subr.bf16.mxu1 %v10203_v41  ;;  %12030 = vst [vmem:[#allocation44_spill] sm:$0xff] %v10548_v32 }
 0x18c   : > { %7638 = vmatmul.mubr.f32.vlgmr.msra.gmra.mrb[16].mxu1 %v10263_v63 }
 0x18d   : > { %7640 = vmatprep.mubr.f32.mxu1 %v10297_v55  ;;  %8648 = vmatpush3.bf16.msra.mxu1 %v10203_v41 }
 0x18e   : > { %8650 = vmatprep.subr.bf16.mxu1 %v10524_v6 }
 0x190   : > { %7641 = vmatmul.mubr.f32.gmra.mrb[18].mxu1 %v10288_v10 }
 0x191   : > { %7643 = vmatprep.mubr.f32.mxu1 %v10339_v20  ;;  %8652 = vmatpush3.bf16.msra.mxu1 %v10524_v6 }
 0x192   : > { %8654 = vmatprep.subr.bf16.mxu1 %v10532_v43 }
 0x194   : > { %7644 = vmatmul.mubr.f32.gmra.mrb[20].mxu1 %v10331_v51 }
 0x195   : > { %7646 = vmatprep.mubr.f32.mxu1 %v10369_v21  ;;  %8656 = vmatpush3.bf16.msra.mxu1 %v10532_v43  ;;  %v12039_v43 = vand.u32 4294901760, %v10225_v33  ;;  %v12046_v33 = vand.u32 4294901760, %v10354_v56 }
 0x196   : > { %8658 = vmatprep.subr.bf16.mxu1 %v10540_v14 }
 0x198   : > { %7647 = vmatmul.mubr.f32.gmra.mrb[22].mxu1 %v10362_v3 }
 0x199   : > { %7649 = vmatprep.mubr.f32.mxu1 %v10402_v27  ;;  %8660 = vmatpush3.bf16.msra.mxu1 %v10540_v14  ;;  %v12038_v14 = vand.u32 4294901760, %v10220_v28  ;;  %v12045_v28 = vand.u32 4294901760, %v10312_v25 }
 0x19a   : > { %8662 = vmatprep.subr.bf16.mxu1 %v10548_v32 }
 0x19b   : > { %v10623_v6 = vpack.c.bf16 %v12039_v43, %v12038_v14 }
 0x19c   : > { %7650 = vmatmul.mubr.f32.gmra.mrb[24].mxu1 %v10396_v58 }
 0x19d   : > { %7652 = vmatprep.mubr.f32.mxu1 %v10430_v5  ;;  %8664 = vmatpush3.bf16.msra.mxu1 %v10548_v32  ;;  %v12037_v32 = vand.u32 4294901760, %v10281_v15 }
 0x19e   : > { %8666 = vmatprep.subr.bf16.mxu1 %v10207_v54 }
 0x1a0   : > { %7653 = vmatmul.mubr.f32.gmra.mrb[26].mxu1 %v10426_v30 }
 0x1a1   : > { %7655 = vmatprep.mubr.f32.mxu1 %v10460_v2  ;;  %8668 = vmatpush3.bf16.msra.mxu1 %v10207_v54 }
 0x1a2   : > { %8670 = vmatprep.subr.bf16.mxu1 %v10211_v59 }
 0x1a4   : > { %7656 = vmatmul.mubr.f32.gmra.mrb[28].mxu1 %v10456_v37 }
 0x1a5   : > { %7658 = vmatprep.mubr.f32.mxu1 %v10488_v26  ;;  %8672 = vmatpush3.bf16.msra.mxu1 %v10211_v59 }
 0x1a6   : > { %8674 = vmatprep.subr.bf16.mxu1 %v10215_v1 }
 0x1a8   : > { %7659 = vmatmul.mubr.f32.gmra.mrb[30].mxu1 %v10484_v49 }
 0x1a9   : > { %8676 = vmatpush3.bf16.msra.mxu1 %v10215_v1  ;;  %7693 = vmatprep.mubr.f32.mxu1 %v10281_v15  ;;  %v12035_v1 = vld [vmem:[#allocation10_spill] sm:$0xff]  ;;  %v12043_v15 = vand.u32 4294901760, %v10235_v36  ;;  %v12051_v36 = vand.u32 4294901760, %v10388_v52 }
 0x1aa   : > { %8678 = vmatprep.subr.bf16.mxu1 %v9964_v11  ;;  %v12036_v59 = vand.u32 4294901760, %v12035_v1  ;;  %v12042_v1 = vand.u32 4294901760, %v10230_v34  ;;  %v12050_v34 = vand.u32 4294901760, %v10345_v39 }
 0x1ac   : > { %7694 = vmatmul.mubr.f32.vlgmr.msra.gmra.mrb[16].mxu1 %v10275_v31  ;;  %v10612_v54 = vpack.c.bf16 %v12036_v59, %v12034_v12  ;;  %v12041_v59 = vand.u32 4294901760, %v10320_v0  ;;  %v10635_v12 = vpack.c.bf16 %v12043_v15, %v12042_v1  ;;  %v12047_v31 = vand.u32 4294901760, %v10260_v62  ;;  %v12066_v1 = vld [vmem:[#allocation16_spill] sm:$0xff] }
 0x1ad   : > { %7696 = vmatprep.mubr.f32.mxu1 %v10320_v0  ;;  %8680 = vmatpush3.bf16.msra.mxu1 %v9964_v11  ;;  %v12048_v0 = vand.u32 4294901760, %v10268_v4  ;;  %v12055_v62 = vand.u32 4294901760, %v10378_v47  ;;  %v12056_v4 = vand.u32 4294901760, %v10418_v8  ;;  %v12067_v15 = vand.u32 4294901760, %v12066_v1 }
 0x1ae   : > { %8682 = vmatprep.subr.bf16.mxu1 %v10023_v18  ;;  %12044 = vst [vmem:[#allocation8_spill] sm:$0xff] %v10635_v12 }
 0x1af   : > { %v10647_v43 = vpack.c.bf16 %v12048_v0, %v12047_v31  ;;  %v12070_v31 = vand.u32 4294901760, %v10476_v46  ;;  %v12073_v0 = vld [vmem:[#allocation18_spill] sm:$0xff] }
 0x1b0   : > { %7697 = vmatmul.mubr.f32.gmra.mrb[18].mxu1 %v10312_v25  ;;  %v12053_v25 = vand.u32 4294901760, %v10305_v44  ;;  %v12062_v44 = vand.u32 4294901760, %v10408_v57 }
 0x1b1   : > { %7699 = vmatprep.mubr.f32.mxu1 %v10354_v56  ;;  %8684 = vmatpush3.bf16.msra.mxu1 %v10023_v18  ;;  %12049 = vst [vmem:[#allocation11_spill] sm:$0xff] %v10647_v43  ;;  %v12052_v56 = vand.u32 4294901760, %v10294_v50  ;;  %v12063_v50 = vand.u32 4294901760, %v10448_v24 }
 0x1b2   : > { %8686 = vmatprep.subr.bf16.mxu1 %v10047_v16 }
 0x1b3   : > { %v10659_v14 = vpack.c.bf16 %v12053_v25, %v12052_v56  ;;  %v12076_v56 = vand.u32 4294901760, %v10466_v23  ;;  %v12077_v25 = vand.u32 4294901760, %v10502_v13 }
 0x1b4   : > { %7700 = vmatmul.mubr.f32.gmra.mrb[20].mxu1 %v10345_v39 }
 0x1b5   : > { %7702 = vmatprep.mubr.f32.mxu1 %v10388_v52  ;;  %8688 = vmatpush3.bf16.msra.mxu1 %v10047_v16  ;;  %12054 = vst [vmem:[#allocation9_spill] sm:$0xff] %v10659_v14  ;;  %v12057_v52 = vld [vmem:[#allocation13_spill] sm:$0xff] }
 0x1b6   : > { %8690 = vmatprep.subr.bf16.mxu1 %v10071_v29  ;;  %v12058_v39 = vand.u32 4294901760, %v12057_v52 }
 0x1b8   : > { %7703 = vmatmul.mubr.f32.gmra.mrb[22].mxu1 %v10378_v47  ;;  %v12064_v47 = vld [vmem:[#allocation15_spill] sm:$0xff] }
 0x1b9   : > { %7705 = vmatprep.mubr.f32.mxu1 %v10418_v8  ;;  %8692 = vmatpush3.bf16.msra.mxu1 %v10071_v29  ;;  %v12065_v8 = vand.u32 4294901760, %v12064_v47 }
 0x1ba   : > { %8694 = vmatprep.subr.bf16.mxu1 %v10085_v38 }
 0x1bc   : > { %7706 = vmatmul.mubr.f32.gmra.mrb[24].mxu1 %v10408_v57  ;;  %v12071_v57 = vld [vmem:[#allocation17_spill] sm:$0xff] }
 0x1bd   : > { %7708 = vmatprep.mubr.f32.mxu1 %v10448_v24  ;;  %8696 = vmatpush3.bf16.msra.mxu1 %v10085_v38  ;;  %v12072_v24 = vand.u32 4294901760, %v12071_v57 }
 0x1be   : > { %8698 = vmatprep.subr.bf16.mxu1 %v10114_v61 }
 0x1c0   : > { %7709 = vmatmul.mubr.f32.gmra.mrb[26].mxu1 %v10438_v60 }
 0x1c1   : > { %7711 = vmatprep.mubr.f32.mxu1 %v10476_v46  ;;  %8700 = vmatpush3.bf16.msra.mxu1 %v10114_v61  ;;  %v12078_v46 = vand.u32 4294901760, %v10494_v9 }
 0x1c2   : > { %8702 = vmatprep.subr.bf16.mxu1 %v12031_v17 }
 0x1c4   : > { %7712 = vmatmul.mubr.f32.gmra.mrb[28].mxu1 %v10466_v23 }
 0x1c5   : > { %7714 = vmatprep.mubr.f32.mxu1 %v10502_v13  ;;  %8704 = vmatpush3.bf16.msra.mxu1 %v12031_v17 }
 0x1c6   : > { %8706 = vmatprep.subr.bf16.mxu1 %v12032_v42 }
 0x1c8   : > { %7715 = vmatmul.mubr.f32.gmra.mrb[30].mxu1 %v10494_v9 }
 0x1c9   : > { %8708 = vmatpush3.bf16.msra.mxu1 %v12032_v42  ;;  %7749 = vmatprep.mubr.f32.mxu1 %v12037_v32  ;;  %v12059_v32 = vld [vmem:[#allocation14_spill] sm:$0xff] }
 0x1ca   : > { %8710 = vmatprep.subr.bf16.mxu1 %v10612_v54 }
 0x1cc   : > { %7750 = vmatmul.mubr.f32.vlgmr.msra.gmra.mrb[16].mxu1 %v12040_v40  ;;  %v12060_v40 = vand.u32 4294901760, %v12059_v32 }
 0x1cd   : > { %7752 = vmatprep.mubr.f32.mxu1 %v12041_v59  ;;  %8712 = vmatpush3.bf16.msra.mxu1 %v10612_v54 }
 0x1ce   : > { %8714 = vmatprep.subr.bf16.mxu1 %v10623_v6  ;;  %v10671_v59 = vpack.c.bf16 %v12060_v40, %v12058_v39 }
 0x1d0   : > { %7753 = vmatmul.mubr.f32.gmra.mrb[18].mxu1 %v12045_v28  ;;  %12061 = vst [vmem:[#allocation10_spill] sm:$0xff] %v10671_v59  ;;  %v10683_v28 = vpack.c.bf16 %v12067_v15, %v12065_v8 }
 0x1d1   : > { %7755 = vmatprep.mubr.f32.mxu1 %v12046_v33  ;;  %8716 = vmatpush3.bf16.msra.mxu1 %v10623_v6  ;;  %v12069_v33 = vand.u32 4294901760, %v10438_v60 }
 0x1d2   : > { %8718 = vmatprep.subr.bf16.mxu1 %v10635_v12  ;;  %12068 = vst [vmem:[#allocation13_spill] sm:$0xff] %v10683_v28 }
 0x1d4   : > { %7756 = vmatmul.mubr.f32.gmra.mrb[20].mxu1 %v12050_v34  ;;  %v12074_v34 = vand.u32 4294901760, %v12073_v0 }
 0x1d5   : > { %7758 = vmatprep.mubr.f32.mxu1 %v12051_v36  ;;  %8720 = vmatpush3.bf16.msra.mxu1 %v10635_v12 }
 0x1d6   : > { %8722 = vmatprep.subr.bf16.mxu1 %v10647_v43  ;;  %v10695_v36 = vpack.c.bf16 %v12074_v34, %v12072_v24 }
 0x1d8   : > { %7759 = vmatmul.mubr.f32.gmra.mrb[22].mxu1 %v12055_v62  ;;  %12075 = vst [vmem:[#allocation14_spill] sm:$0xff] %v10695_v36 }
 0x1d9   : > { %7761 = vmatprep.mubr.f32.mxu1 %v12056_v4  ;;  %8724 = vmatpush3.bf16.msra.mxu1 %v10647_v43 }
 0x1da   : > { %8726 = vmatprep.subr.bf16.mxu1 %v10659_v14 }
 0x1dc   : > { %7762 = vmatmul.mubr.f32.gmra.mrb[24].mxu1 %v12062_v44 }
 0x1dd   : > { %7764 = vmatprep.mubr.f32.mxu1 %v12063_v50  ;;  %8728 = vmatpush3.bf16.msra.mxu1 %v10659_v14 }
 0x1de   : > { %8730 = vmatprep.subr.bf16.mxu1 %v10671_v59 }
 0x1e0   : > { %7765 = vmatmul.mubr.f32.gmra.mrb[26].mxu1 %v12069_v33 }
 0x1e1   : > { %7767 = vmatprep.mubr.f32.mxu1 %v12070_v31  ;;  %8732 = vmatpush3.bf16.msra.mxu1 %v10671_v59 }
 0x1e2   : > { %8734 = vmatprep.subr.bf16.mxu1 %v10683_v28 }
 0x1e4   : > { %7768 = vmatmul.mubr.f32.gmra.mrb[28].mxu1 %v12076_v56 }
 0x1e5   : > { %7770 = vmatprep.mubr.f32.mxu1 %v12077_v25  ;;  %8736 = vmatpush3.bf16.msra.mxu1 %v10683_v28 }
 0x1e6   : > { %8738 = vmatprep.subr.bf16.mxu1 %v10695_v36 }
 0x1e8   : > { %7771 = vmatmul.mubr.f32.gmra.mrb[30].mxu1 %v12078_v46 }
 0x1e9   : > { %8740 = vmatpush3.bf16.msra.mxu1 %v10695_v36  ;;  %7805 = vmatprep.mubr.f32.mxu1 %v10271_v7 }
 0x1ea   : > { %8742 = vmatprep.subr.bf16.mxu1 %v9964_v11 }
 0x1ec   : > { %7806 = vmatmul.mubr.f32.vlgmr.msra.gmra.mrb[16].mxu1 %v10263_v63 }
 0x1ed   : > { %7808 = vmatprep.mubr.f32.mxu1 %v10297_v55  ;;  %8744 = vmatpush3.bf16.msra.mxu1 %v9964_v11 }
 0x1ee   : > { %8746 = vmatprep.subr.bf16.mxu1 %v10023_v18 }
 0x1f0   : > { %7809 = vmatmul.mubr.f32.gmra.mrb[18].mxu1 %v10288_v10 }
 0x1f1   : > { %7811 = vmatprep.mubr.f32.mxu1 %v10339_v20  ;;  %8748 = vmatpush3.bf16.msra.mxu1 %v10023_v18 }
 0x1f2   : > { %8750 = vmatprep.subr.bf16.mxu1 %v10047_v16 }
 0x1f4   : > { %7812 = vmatmul.mubr.f32.gmra.mrb[20].mxu1 %v10331_v51 }
 0x1f5   : > { %7814 = vmatprep.mubr.f32.mxu1 %v10369_v21  ;;  %8752 = vmatpush3.bf16.msra.mxu1 %v10047_v16 }
 0x1f6   : > { %8754 = vmatprep.subr.bf16.mxu1 %v10071_v29 }
 0x1f8   : > { %7815 = vmatmul.mubr.f32.gmra.mrb[22].mxu1 %v10362_v3 }
 0x1f9   : > { %7817 = vmatprep.mubr.f32.mxu1 %v10402_v27  ;;  %8756 = vmatpush3.bf16.msra.mxu1 %v10071_v29 }
 0x1fa   : > { %8758 = vmatprep.subr.bf16.mxu1 %v10085_v38 }
 0x1fc   : > { %7818 = vmatmul.mubr.f32.gmra.mrb[24].mxu1 %v10396_v58 }
 0x1fd   : > { %7820 = vmatprep.mubr.f32.mxu1 %v10430_v5  ;;  %8760 = vmatpush3.bf16.msra.mxu1 %v10085_v38 }
 0x1fe   : > { %8762 = vmatprep.subr.bf16.mxu1 %v10114_v61 }
 0x200   : > { %7821 = vmatmul.mubr.f32.gmra.mrb[26].mxu1 %v10426_v30 }
 0x201   : > { %7823 = vmatprep.mubr.f32.mxu1 %v10460_v2  ;;  %8764 = vmatpush3.bf16.msra.mxu1 %v10114_v61 }
 0x202   : > { %8766 = vmatprep.subr.bf16.mxu1 %v12031_v17 }
 0x204   : > { %7824 = vmatmul.mubr.f32.gmra.mrb[28].mxu1 %v10456_v37 }
 0x205   : > { %7826 = vmatprep.mubr.f32.mxu1 %v10488_v26  ;;  %8768 = vmatpush3.bf16.msra.mxu1 %v12031_v17 }
 0x206   : > { %8770 = vmatprep.subr.bf16.mxu1 %v12032_v42 }
 0x208   : > { %7827 = vmatmul.mubr.f32.gmra.mrb[30].mxu1 %v10484_v49 }
 0x209   : > { %8772 = vmatpush3.bf16.msra.mxu1 %v12032_v42  ;;  %7861 = vmatprep.mubr.f32.mxu1 %v10271_v7  ;;  %v10773_v7 = vsub.f32 %v10572_v22, %v10576_v45 }
 0x20a   : > { %8774 = vmatprep.subr.bf16.mxu1 %v9964_v11 }
 0x20c   : > { %7862 = vmatmul.mubr.f32.vlgmr.msra.gmra.mrb[16].mxu1 %v10263_v63  ;;  %v12079_v63 = vld [vmem:[#allocation12_spill] sm:$0xff] }
 0x20d   : > { %7864 = vmatprep.mubr.f32.mxu1 %v10297_v55  ;;  %8776 = vmatpush3.bf16.msra.mxu1 %v9964_v11 }
 0x20e   : > { %8778 = vmatprep.subr.bf16.mxu1 %v10023_v18 }
 0x210   : > { %7865 = vmatmul.mubr.f32.gmra.mrb[18].mxu1 %v10288_v10 }
 0x211   : > { %7867 = vmatprep.mubr.f32.mxu1 %v10339_v20  ;;  %8780 = vmatpush3.bf16.msra.mxu1 %v10023_v18 }
 0x212   : > { %8782 = vmatprep.subr.bf16.mxu1 %v10047_v16 }
 0x214   : > { %7868 = vmatmul.mubr.f32.gmra.mrb[20].mxu1 %v10331_v51 }
 0x215   : > { %7870 = vmatprep.mubr.f32.mxu1 %v10369_v21  ;;  %8784 = vmatpush3.bf16.msra.mxu1 %v10047_v16 }
 0x216   : > { %8786 = vmatprep.subr.bf16.mxu1 %v10071_v29 }
 0x218   : > { %7871 = vmatmul.mubr.f32.gmra.mrb[22].mxu1 %v10362_v3 }
 0x219   : > { %7873 = vmatprep.mubr.f32.mxu1 %v10402_v27  ;;  %8788 = vmatpush3.bf16.msra.mxu1 %v10071_v29 }
 0x21a   : > { %8790 = vmatprep.subr.bf16.mxu1 %v10085_v38 }
 0x21c   : > { %7874 = vmatmul.mubr.f32.gmra.mrb[24].mxu1 %v10396_v58 }
 0x21d   : > { %7876 = vmatprep.mubr.f32.mxu1 %v10430_v5  ;;  %8792 = vmatpush3.bf16.msra.mxu1 %v10085_v38  ;;  %v10776_v5 = vand.u32 4294901760, %v10773_v7 }
 0x21e   : > { %8794 = vmatprep.subr.bf16.mxu1 %v10114_v61 }
 0x21f   : > { %v3085_v10 = vsub.f32 %v10773_v7, %v10776_v5 }
 0x220   : > { %7877 = vmatmul.mubr.f32.gmra.mrb[26].mxu1 %v10426_v30 }
 0x221   : > { %7879 = vmatprep.mubr.f32.mxu1 %v10460_v2  ;;  %8796 = vmatpush3.bf16.msra.mxu1 %v10114_v61  ;;  %v10780_v55 = vand.u32 4294901760, %v3085_v10 }
 0x222   : > { %8798 = vmatprep.subr.bf16.mxu1 %v12031_v17 }
 0x223   : > { %7911 = vmatprep.subr.mxu0 %v10780_v55 }
 0x224   : > { %7880 = vmatmul.mubr.f32.gmra.mrb[28].mxu1 %v10456_v37 }
 0x225   : > { %7882 = vmatprep.mubr.f32.mxu1 %v10488_v26  ;;  %8800 = vmatpush3.bf16.msra.mxu1 %v12031_v17 }
 0x226   : > { %8802 = vmatprep.subr.bf16.mxu1 %v12032_v42 }
 0x228   : > { %7883 = vmatmul.mubr.f32.gmra.mrb[30].mxu1 %v10484_v49 }
 0x229   : > { %8804 = vmatpush3.bf16.msra.mxu1 %v12032_v42 }
 0x22a   : > { %8806 = vmatprep.subr.bf16.mxu1 %v12079_v63 }
 0x2df   : > { %v7863_v51 = vpop.f32.mrb[16].mxu1 }
 0x2e0   : > { %v2787_v20 = vmul.f32 0.03125, %v7863_v51  ;;  %v2692_v27 = vpop.f32.mrb[17].mxu1 }
 0x2e1   : > { %v2786_v3 = vmul.f32 0.03125, %v2692_v27 }
 0x2e2   : > { %v2807_v21 = vsel %vm2802_vm2, %v2787_v20, 0 }
 0x2e3   : > { %v10784_v58 = vand.u32 4294901760, %v2807_v21  ;;  %v2804_v30 = vsel %vm2802_vm2, %v2786_v3, 0  ;;  %v7866_v23 = vpop.f32.mrb[18].mxu1 }
 0x2e4   : > { %v10787_v60 = vand.u32 4294901760, %v2804_v30  ;;  %v2789_v26 = vmul.f32 0.03125, %v7866_v23  ;;  %v2704_v37 = vpop.f32.mrb[19].mxu1 }
 0x2e5   : > { %v10790_v2 = vsub.f32 %v2807_v21, %v10784_v58  ;;  %v2788_v13 = vmul.f32 0.03125, %v2704_v37 }
 0x2e6   : > { %v10793_v49 = vsub.f32 %v2804_v30, %v10787_v60  ;;  %v2813_v9 = vsel %vm2802_vm2, %v2789_v26, 0 }
 0x2e7   : > { %v11935_v22 = vand.u32 4294901760, %v10790_v2  ;;  %v10797_v62 = vand.u32 4294901760, %v2813_v9  ;;  %v2810_v4 = vsel %vm2802_vm2, %v2788_v13, 0  ;;  %v7869_v52 = vpop.f32.mrb[20].mxu1 }
 0x2e8   : > { %v10800_v39 = vand.u32 4294901760, %v2810_v4  ;;  %v2791_v32 = vmul.f32 0.03125, %v7869_v52  ;;  %v2716_v40 = vpop.f32.mrb[21].mxu1  ;;  %v11937_v44 = vand.u32 4294901760, %v10793_v49 }
 0x2e9   : > { %v2934_v50 = vsub.f32 %v10790_v2, %v11935_v22  ;;  %v10807_v47 = vsub.f32 %v2813_v9, %v10797_v62  ;;  %v2790_v8 = vmul.f32 0.03125, %v2716_v40 }
 0x2ea   : > { %v10810_v1 = vsub.f32 %v2810_v4, %v10800_v39  ;;  %v2819_v15 = vsel %vm2802_vm2, %v2791_v32, 0  ;;  %v2924_v33 = vsub.f32 %v10793_v49, %v11937_v44 }
 0x2eb   : > { %v10816_v31 = vand.u32 4294901760, %v2819_v15  ;;  %v2816_v57 = vsel %vm2802_vm2, %v2790_v8, 0  ;;  %v7872_v24 = vpop.f32.mrb[22].mxu1  ;;  %v11932_v0 = vand.u32 4294901760, %v10807_v47  ;;  %v2935_v51 = vand.u32 4294901760, %v2934_v50 }
 0x2ec   : > { %v10820_v34 = vand.u32 4294901760, %v2816_v57  ;;  %v2793_v56 = vmul.f32 0.03125, %v7872_v24  ;;  %v2728_v25 = vpop.f32.mrb[23].mxu1  ;;  %v2925_v46 = vand.u32 4294901760, %v2924_v33  ;;  %v11934_v10 = vand.u32 4294901760, %v10810_v1 }
 0x2ed   : > { %v10824_v20 = vsub.f32 %v2819_v15, %v10816_v31  ;;  %v2792_v27 = vmul.f32 0.03125, %v2728_v25  ;;  %v2954_v3 = vsub.f32 %v10807_v47, %v11932_v0 }
 0x2ee   : > { %v10830_v21 = vsub.f32 %v2816_v57, %v10820_v34  ;;  %v2825_v30 = vsel %vm2802_vm2, %v2793_v56, 0  ;;  %7887 = vmatprep.mubr.f32.mxu0 %v2925_v46  ;;  %v2944_v23 = vsub.f32 %v10810_v1, %v11934_v10 }
 0x2ef   : > { %v10836_v26 = vand.u32 4294901760, %v2825_v30  ;;  %v2822_v37 = vsel %vm2802_vm2, %v2792_v27, 0  ;;  %v7875_v13 = vpop.f32.mrb[24].mxu1  ;;  %7888 = vmatmul.mubr.f32.vlgmr.msra.gmra.mrb[16].mxu0 %v2935_v51  ;;  %v11930_v9 = vand.u32 4294901760, %v10824_v20  ;;  %v2955_v33 = vand.u32 4294901760, %v2954_v3 }
 0x2f0   : > { %v10840_v4 = vand.u32 4294901760, %v2822_v37  ;;  %v2795_v52 = vmul.f32 0.03125, %v7875_v13  ;;  %v2740_v32 = vpop.f32.mrb[25].mxu1  ;;  %7912 = vmatpush3.msra.mxu0 %v10780_v55  ;;  %v2945_v40 = vand.u32 4294901760, %v2944_v23  ;;  %v11931_v50 = vand.u32 4294901760, %v10830_v21 }
 0x2f1   : > { %v10845_v8 = vsub.f32 %v2825_v30, %v10836_v26  ;;  %v2794_v15 = vmul.f32 0.03125, %v2740_v32  ;;  %v2974_v57 = vsub.f32 %v10824_v20, %v11930_v9  ;;  %7937 = vmatprep.subr.mxu0 %v10773_v7 }
 0x2f2   : > { %v10852_v24 = vsub.f32 %v2822_v37, %v10840_v4  ;;  %v2831_v56 = vsel %vm2802_vm2, %v2795_v52, 0  ;;  %7890 = vmatprep.mubr.f32.mxu0 %v2945_v40  ;;  %v2964_v25 = vsub.f32 %v10830_v21, %v11931_v50 }
 0x2f3   : > { %v10858_v46 = vand.u32 4294901760, %v2831_v56  ;;  %v2828_v51 = vsel %vm2802_vm2, %v2794_v15, 0  ;;  %v7878_v27 = vpop.f32.mrb[26].mxu1  ;;  %7891 = vmatmul.mubr.f32.gmra.mrb[18].mxu0 %v2955_v33  ;;  %v11933_v3 = vand.u32 4294901760, %v10845_v8  ;;  %v2975_v9 = vand.u32 4294901760, %v2974_v57 }
 0x2f4   : > { %v10862_v30 = vand.u32 4294901760, %v2828_v51  ;;  %v2797_v23 = vmul.f32 0.03125, %v7878_v27  ;;  %v2752_v37 = vpop.f32.mrb[27].mxu1  ;;  %v2965_v13 = vand.u32 4294901760, %v2964_v25  ;;  %v11936_v52 = vand.u32 4294901760, %v10852_v24 }
 0x2f5   : > { %v10866_v32 = vsub.f32 %v2831_v56, %v10858_v46  ;;  %v2796_v40 = vmul.f32 0.03125, %v2752_v37  ;;  %v2994_v15 = vsub.f32 %v10845_v8, %v11933_v3 }
 0x2f6   : > { %v10872_v33 = vsub.f32 %v2828_v51, %v10862_v30  ;;  %v2837_v50 = vsel %vm2802_vm2, %v2797_v23, 0  ;;  %7893 = vmatprep.mubr.f32.mxu0 %v2965_v13  ;;  %v2984_v25 = vsub.f32 %v10852_v24, %v11936_v52 }
 0x2f7   : > { %v10878_v27 = vand.u32 4294901760, %v2837_v50  ;;  %v2834_v56 = vsel %vm2802_vm2, %v2796_v40, 0  ;;  %v7881_v37 = vpop.f32.mrb[28].mxu1  ;;  %7894 = vmatmul.mubr.f32.gmra.mrb[20].mxu0 %v2975_v9  ;;  %v11940_v57 = vand.u32 4294901760, %v10866_v32  ;;  %v2995_v52 = vand.u32 4294901760, %v2994_v15 }
 0x2f8   : > { %v10882_v0 = vand.u32 4294901760, %v2834_v56  ;;  %v2799_v3 = vmul.f32 0.03125, %v7881_v37  ;;  %v2764_v51 = vpop.f32.mrb[29].mxu1  ;;  %v2985_v10 = vand.u32 4294901760, %v2984_v25  ;;  %v11945_v23 = vand.u32 4294901760, %v10872_v33 }
 0x2f9   : > { %v10886_v13 = vsub.f32 %v2837_v50, %v10878_v27  ;;  %v2798_v22 = vmul.f32 0.03125, %v2764_v51  ;;  %v3014_v40 = vsub.f32 %v10866_v32, %v11940_v57 }
 0x2fa   : > { %v10892_v9 = vsub.f32 %v2834_v56, %v10882_v0  ;;  %v2843_v44 = vsel %vm2802_vm2, %v2799_v3, 0  ;;  %7896 = vmatprep.mubr.f32.mxu0 %v2985_v10  ;;  %v3004_v25 = vsub.f32 %v10872_v33, %v11945_v23 }
 0x2fb   : > { %v10898_v37 = vand.u32 4294901760, %v2843_v44  ;;  %v2840_v50 = vsel %vm2802_vm2, %v2798_v22, 0  ;;  %v7884_v51 = vpop.f32.mrb[30].mxu1  ;;  %7897 = vmatmul.mubr.f32.gmra.mrb[22].mxu0 %v2995_v52  ;;  %v11948_v15 = vand.u32 4294901760, %v10886_v13  ;;  %v3015_v23 = vand.u32 4294901760, %v3014_v40 }
 0x2fc   : > { %v10902_v36 = vand.u32 4294901760, %v2840_v50  ;;  %v2801_v57 = vmul.f32 0.03125, %v7884_v51  ;;  %v2776_v56 = vpop.f32.mrb[31].mxu1  ;;  %v3005_v28 = vand.u32 4294901760, %v3004_v25  ;;  %v11951_v3 = vand.u32 4294901760, %v10892_v9 }
 0x2fd   : > { %v10906_v10 = vsub.f32 %v2843_v44, %v10898_v37  ;;  %v2800_v59 = vmul.f32 0.03125, %v2776_v56  ;;  %v3034_v22 = vsub.f32 %v10886_v13, %v11948_v15 }
 0x2fe   : > { %v10912_v52 = vsub.f32 %v2840_v50, %v10902_v36  ;;  %v2849_v14 = vsel %vm2802_vm2, %v2801_v57, 0  ;;  %7899 = vmatprep.mubr.f32.mxu0 %v3005_v28  ;;  %v3024_v25 = vsub.f32 %v10892_v9, %v11951_v3 }
 0x2ff   : > { %v10918_v51 = vand.u32 4294901760, %v2849_v14  ;;  %v2846_v44 = vsel %vm2802_vm2, %v2800_v59, 0  ;;  %7900 = vmatmul.mubr.f32.gmra.mrb[24].mxu0 %v3015_v23  ;;  %v11954_v40 = vand.u32 4294901760, %v10906_v10  ;;  %v3035_v28 = vand.u32 4294901760, %v3034_v22 }
 0x300   : > { %v10922_v56 = vand.u32 4294901760, %v2846_v44  ;;  %v3025_v15 = vand.u32 4294901760, %v3024_v25  ;;  %v3043_v50 = vand.u32 4294901760, %v10912_v52 }
 0x301   : > { %v10926_v43 = vsub.f32 %v2849_v14, %v10918_v51  ;;  %v3054_v57 = vsub.f32 %v10906_v10, %v11954_v40 }
 0x302   : > { %v10932_v3 = vsub.f32 %v2846_v44, %v10922_v56  ;;  %7902 = vmatprep.mubr.f32.mxu0 %v3025_v15  ;;  %v3044_v59 = vsub.f32 %v10912_v52, %v3043_v50 }
 0x303   : > { %7903 = vmatmul.mubr.f32.gmra.mrb[26].mxu0 %v3035_v28  ;;  %v3073_v23 = vand.u32 4294901760, %v10926_v43  ;;  %v3055_v12 = vand.u32 4294901760, %v3054_v57  ;;  %v12082_v28 = vand.u32 4294901760, %v10810_v1  ;;  %v12083_v57 = vand.u32 4294901760, %v10807_v47 }
 0x304   : > { %v3045_v25 = vand.u32 4294901760, %v3044_v59  ;;  %v3063_v14 = vand.u32 4294901760, %v10932_v3  ;;  %v12085_v59 = vand.u32 4294901760, %v10824_v20 }
 0x305   : > { %v3074_v22 = vsub.f32 %v10926_v43, %v3073_v23 }
 0x306   : > { %7905 = vmatprep.mubr.f32.mxu0 %v3045_v25  ;;  %v3064_v44 = vsub.f32 %v10932_v3, %v3063_v14  ;;  %v12089_v25 = vand.u32 4294901760, %v10866_v32 }
 0x307   : > { %7906 = vmatmul.mubr.f32.gmra.mrb[28].mxu0 %v3055_v12  ;;  %v3075_v40 = vand.u32 4294901760, %v3074_v22  ;;  %v12080_v12 = vand.u32 4294901760, %v10793_v49 }
 0x308   : > { %v3065_v15 = vand.u32 4294901760, %v3064_v44 }
 0x30a   : > { %7908 = vmatprep.mubr.f32.mxu0 %v3065_v15 }
 0x30b   : > { %7909 = vmatmul.mubr.f32.gmra.mrb[30].mxu0 %v3075_v40  ;;  %v12081_v40 = vand.u32 4294901760, %v10790_v2 }
 0x30c   : > { %7913 = vmatprep.mubr.f32.mxu0 %v10787_v60 }
 0x30f   : > { %7914 = vmatmul.mubr.f32.vlgmr.msra.gmra.mrb[16].mxu0 %v10784_v58 }
 0x310   : > { %7916 = vmatprep.mubr.f32.mxu0 %v10800_v39  ;;  %7938 = vmatpush3.msra.mxu0 %v10773_v7 }
 0x311   : > { %7963 = vmatprep.subr.mxu0 %v10576_v45 }
 0x313   : > { %7917 = vmatmul.mubr.f32.gmra.mrb[18].mxu0 %v10797_v62 }
 0x314   : > { %7919 = vmatprep.mubr.f32.mxu0 %v10820_v34 }
 0x317   : > { %7920 = vmatmul.mubr.f32.gmra.mrb[20].mxu0 %v10816_v31 }
 0x318   : > { %7922 = vmatprep.mubr.f32.mxu0 %v10840_v4 }
 0x31b   : > { %7923 = vmatmul.mubr.f32.gmra.mrb[22].mxu0 %v10836_v26 }
 0x31c   : > { %7925 = vmatprep.mubr.f32.mxu0 %v10862_v30 }
 0x31f   : > { %7926 = vmatmul.mubr.f32.gmra.mrb[24].mxu0 %v10858_v46 }
 0x320   : > { %7928 = vmatprep.mubr.f32.mxu0 %v10882_v0 }
 0x323   : > { %7929 = vmatmul.mubr.f32.gmra.mrb[26].mxu0 %v10878_v27 }
 0x324   : > { %7931 = vmatprep.mubr.f32.mxu0 %v10902_v36 }
 0x327   : > { %7932 = vmatmul.mubr.f32.gmra.mrb[28].mxu0 %v10898_v37 }
 0x328   : > { %7934 = vmatprep.mubr.f32.mxu0 %v10922_v56 }
 0x32b   : > { %7935 = vmatmul.mubr.f32.gmra.mrb[30].mxu0 %v10918_v51 }
 0x32c   : > { %7939 = vmatprep.mubr.f32.mxu0 %v10793_v49  ;;  %v12086_v49 = vand.u32 4294901760, %v10852_v24 }
 0x32f   : > { %7940 = vmatmul.mubr.f32.vlgmr.msra.gmra.mrb[16].mxu0 %v10790_v2  ;;  %v12087_v2 = vand.u32 4294901760, %v10845_v8 }
 0x330   : > { %7942 = vmatprep.mubr.f32.mxu0 %v10810_v1  ;;  %7964 = vmatpush3.msra.mxu0 %v10576_v45  ;;  %v12088_v1 = vand.u32 4294901760, %v10872_v33 }
 0x331   : > { %7989 = vmatprep.subr.mxu0 %v10776_v5 }
 0x333   : > { %7943 = vmatmul.mubr.f32.gmra.mrb[18].mxu0 %v10807_v47  ;;  %v12090_v47 = vand.u32 4294901760, %v10892_v9 }
 0x334   : > { %7945 = vmatprep.mubr.f32.mxu0 %v10830_v21 }
 0x337   : > { %7946 = vmatmul.mubr.f32.gmra.mrb[20].mxu0 %v10824_v20  ;;  %v12092_v20 = vand.u32 4294901760, %v10906_v10 }
 0x338   : > { %7948 = vmatprep.mubr.f32.mxu0 %v10852_v24 }
 0x33b   : > { %7949 = vmatmul.mubr.f32.gmra.mrb[22].mxu0 %v10845_v8 }
 0x33c   : > { %7951 = vmatprep.mubr.f32.mxu0 %v10872_v33 }
 0x33f   : > { %7952 = vmatmul.mubr.f32.gmra.mrb[24].mxu0 %v10866_v32 }
 0x340   : > { %7954 = vmatprep.mubr.f32.mxu0 %v10892_v9 }
 0x343   : > { %7955 = vmatmul.mubr.f32.gmra.mrb[26].mxu0 %v10886_v13 }
 0x344   : > { %7957 = vmatprep.mubr.f32.mxu0 %v10912_v52 }
 0x347   : > { %7958 = vmatmul.mubr.f32.gmra.mrb[28].mxu0 %v10906_v10 }
 0x348   : > { %7960 = vmatprep.mubr.f32.mxu0 %v10932_v3  ;;  %v12084_v3 = vand.u32 4294901760, %v10830_v21  ;;  %v12091_v21 = vand.u32 4294901760, %v10886_v13 }
 0x34b   : > { %7961 = vmatmul.mubr.f32.gmra.mrb[30].mxu0 %v10926_v43 }
 0x34c   : > { %7965 = vmatprep.mubr.f32.mxu0 %v12080_v12 }
 0x34f   : > { %7966 = vmatmul.mubr.f32.vlgmr.msra.gmra.mrb[16].mxu0 %v12081_v40 }
 0x350   : > { %7968 = vmatprep.mubr.f32.mxu0 %v12082_v28  ;;  %7990 = vmatpush3.msra.mxu0 %v10776_v5 }
 0x351   : > { %8015 = vmatprep.subr.mxu0 %v10576_v45 }
 0x353   : > { %7969 = vmatmul.mubr.f32.gmra.mrb[18].mxu0 %v12083_v57 }
 0x354   : > { %7971 = vmatprep.mubr.f32.mxu0 %v12084_v3 }
 0x357   : > { %7972 = vmatmul.mubr.f32.gmra.mrb[20].mxu0 %v12085_v59 }
 0x358   : > { %7974 = vmatprep.mubr.f32.mxu0 %v12086_v49 }
 0x35b   : > { %7975 = vmatmul.mubr.f32.gmra.mrb[22].mxu0 %v12087_v2  ;;  %v12102_v2 = vld [vmem:[#allocation30_spill] sm:$0xff] }
 0x35c   : > { %7977 = vmatprep.mubr.f32.mxu0 %v12088_v1 }
 0x35f   : > { %7978 = vmatmul.mubr.f32.gmra.mrb[24].mxu0 %v12089_v25 }
 0x360   : > { %7980 = vmatprep.mubr.f32.mxu0 %v12090_v47 }
 0x363   : > { %7981 = vmatmul.mubr.f32.gmra.mrb[26].mxu0 %v12091_v21 }
 0x364   : > { %7983 = vmatprep.mubr.f32.mxu0 %v3043_v50 }
 0x367   : > { %7984 = vmatmul.mubr.f32.gmra.mrb[28].mxu0 %v12092_v20  ;;  %v12104_v20 = vld [vmem:[#allocation31_spill] sm:$0xff] }
 0x368   : > { %7986 = vmatprep.mubr.f32.mxu0 %v3063_v14  ;;  %v12100_v14 = vld [vmem:[#allocation29_spill] sm:$0xff] }
 0x36b   : > { %7987 = vmatmul.mubr.f32.gmra.mrb[30].mxu0 %v3073_v23 }
 0x36c   : > { %7991 = vmatprep.mubr.f32.mxu0 %v10787_v60 }
 0x36f   : > { %7992 = vmatmul.mubr.f32.vlgmr.msra.gmra.mrb[16].mxu0 %v10784_v58 }
 0x370   : > { %7994 = vmatprep.mubr.f32.mxu0 %v10800_v39  ;;  %8016 = vmatpush3.msra.mxu0 %v10576_v45 }
 0x371   : > { %8377 = vmatprep.subr.mxu0 %v10576_v45 }
 0x373   : > { %7995 = vmatmul.mubr.f32.gmra.mrb[18].mxu0 %v10797_v62 }
 0x374   : > { %7997 = vmatprep.mubr.f32.mxu0 %v10820_v34 }
 0x377   : > { %7998 = vmatmul.mubr.f32.gmra.mrb[20].mxu0 %v10816_v31 }
 0x378   : > { %8000 = vmatprep.mubr.f32.mxu0 %v10840_v4 }
 0x37b   : > { %8001 = vmatmul.mubr.f32.gmra.mrb[22].mxu0 %v10836_v26 }
 0x37c   : > { %8003 = vmatprep.mubr.f32.mxu0 %v10862_v30 }
 0x37f   : > { %8004 = vmatmul.mubr.f32.gmra.mrb[24].mxu0 %v10858_v46 }
 0x380   : > { %8006 = vmatprep.mubr.f32.mxu0 %v10882_v0 }
 0x383   : > { %8007 = vmatmul.mubr.f32.gmra.mrb[26].mxu0 %v10878_v27 }
 0x384   : > { %8009 = vmatprep.mubr.f32.mxu0 %v10902_v36 }
 0x387   : > { %8010 = vmatmul.mubr.f32.gmra.mrb[28].mxu0 %v10898_v37 }
 0x388   : > { %8012 = vmatprep.mubr.f32.mxu0 %v10922_v56 }
 0x38b   : > { %8013 = vmatmul.mubr.f32.gmra.mrb[30].mxu0 %v10918_v51 }
 0x38c   : > { %8017 = vmatprep.mubr.f32.mxu0 %v10787_v60 }
 0x38f   : > { %8018 = vmatmul.mubr.f32.vlgmr.msra.gmra.mrb[16].mxu0 %v10784_v58  ;;  %v12093_v58 = vld [vmem:[#allocation22_spill] sm:$0xff] }
 0x390   : > { %8020 = vmatprep.mubr.f32.mxu0 %v10800_v39  ;;  %8378 = vmatpush3.msra.mxu0 %v10576_v45  ;;  %v12094_v39 = vld [vmem:[#allocation23_spill] sm:$0xff] }
 0x391   : > { %8403 = vmatprep.subr.mxu0 %v10780_v55 }
 0x393   : > { %8021 = vmatmul.mubr.f32.gmra.mrb[18].mxu0 %v10797_v62 }
 0x394   : > { %8023 = vmatprep.mubr.f32.mxu0 %v10820_v34 }
 0x397   : > { %8024 = vmatmul.mubr.f32.gmra.mrb[20].mxu0 %v10816_v31 }
 0x398   : > { %8026 = vmatprep.mubr.f32.mxu0 %v10840_v4  ;;  %v12095_v4 = vld [vmem:[#allocation24_spill] sm:$0xff] }
 0x39b   : > { %8027 = vmatmul.mubr.f32.gmra.mrb[22].mxu0 %v10836_v26 }
 0x39c   : > { %8029 = vmatprep.mubr.f32.mxu0 %v10862_v30  ;;  %v12096_v30 = vld [vmem:[#allocation25_spill] sm:$0xff] }
 0x39f   : > { %8030 = vmatmul.mubr.f32.gmra.mrb[24].mxu0 %v10858_v46 }
 0x3a0   : > { %8032 = vmatprep.mubr.f32.mxu0 %v10882_v0 }
 0x3a3   : > { %8033 = vmatmul.mubr.f32.gmra.mrb[26].mxu0 %v10878_v27 }
 0x3a4   : > { %8035 = vmatprep.mubr.f32.mxu0 %v10902_v36 }
 0x3a7   : > { %8036 = vmatmul.mubr.f32.gmra.mrb[28].mxu0 %v10898_v37 }
 0x3a8   : > { %8038 = vmatprep.mubr.f32.mxu0 %v10922_v56 }
 0x3ab   : > { %8039 = vmatmul.mubr.f32.gmra.mrb[30].mxu0 %v10918_v51  ;;  %v12098_v51 = vld [vmem:[#allocation27_spill] sm:$0xff] }
 0x462   : > { %v8019_v43 = vpop.f32.mrb[16].mxu0 }
 0x463   : > { %v11048_v60 = vsub.f32 %v12093_v58, %v8019_v43  ;;  %v3852_v62 = vpop.f32.mrb[17].mxu0 }
 0x464   : > { %v11051_v31 = vsub.f32 %v12094_v39, %v3852_v62 }
 0x465   : > { %v3963_v0 = vmul.f32 %v11048_v60, %v11048_v60 }
 0x466   : > { %v3962_v36 = vmul.f32 %v11051_v31, %v11051_v31  ;;  %v8022_v34 = vpop.f32.mrb[18].mxu0 }
 0x467   : > { %v11057_v26 = vand.u32 4294901760, %v3963_v0  ;;  %v11060_v8 = vsub.f32 %v12095_v4, %v8022_v34  ;;  %v3864_v24 = vpop.f32.mrb[19].mxu0 }
 0x468   : > { %v11062_v46 = vand.u32 4294901760, %v3962_v36  ;;  %v11065_v32 = vsub.f32 %v12096_v30, %v3864_v24 }
 0x469   : > { %v11068_v33 = vsub.f32 %v3963_v0, %v11057_v26  ;;  %v3965_v27 = vmul.f32 %v11060_v8, %v11060_v8 }
 0x46a   : > { %12097 = vst [vmem:[#allocation15_spill] sm:$0xff] %v11065_v32  ;;  %v11073_v13 = vsub.f32 %v3962_v36, %v11062_v46  ;;  %v3964_v9 = vmul.f32 %v11065_v32, %v11065_v32  ;;  %v8025_v37 = vpop.f32.mrb[20].mxu0 }
 0x46b   : > { %v11958_v10 = vand.u32 4294901760, %v11068_v33  ;;  %v11078_v52 = vand.u32 4294901760, %v3965_v27  ;;  %v11081_v56 = vsub.f32 %v12098_v51, %v8025_v37  ;;  %v3876_v50 = vpop.f32.mrb[21].mxu0  ;;  %v12106_v37 = vld [vmem:[#allocation32_spill] sm:$0xff] }
 0x46c   : > { %v11083_v23 = vand.u32 4294901760, %v3964_v9  ;;  %v11086_v22 = vsub.f32 %v12100_v14, %v3876_v50  ;;  %v11960_v44 = vand.u32 4294901760, %v11073_v13 }
 0x46d   : > { %12099 = vst [vmem:[#allocation16_spill] sm:$0xff] %v11081_v56  ;;  %v4072_v15 = vsub.f32 %v11068_v33, %v11958_v10  ;;  %v11093_v12 = vsub.f32 %v3965_v27, %v11078_v52  ;;  %v3967_v40 = vmul.f32 %v11081_v56, %v11081_v56 }
 0x46e   : > { %12101 = vst [vmem:[#allocation17_spill] sm:$0xff] %v11086_v22  ;;  %v11098_v28 = vsub.f32 %v3964_v9, %v11083_v23  ;;  %v3966_v57 = vmul.f32 %v11086_v22, %v11086_v22  ;;  %v8028_v3 = vpop.f32.mrb[22].mxu0  ;;  %v4062_v59 = vsub.f32 %v11073_v13, %v11960_v44 }
 0x46f   : > { %v11105_v49 = vand.u32 4294901760, %v3967_v40  ;;  %v11108_v1 = vsub.f32 %v12102_v2, %v8028_v3  ;;  %v3888_v25 = vpop.f32.mrb[23].mxu0  ;;  %v11956_v47 = vand.u32 4294901760, %v11093_v12  ;;  %v4073_v39 = vand.u32 4294901760, %v4072_v15 }
 0x470   : > { %v11111_v21 = vand.u32 4294901760, %v3966_v57  ;;  %v11114_v43 = vsub.f32 %v12104_v20, %v3888_v25  ;;  %v4063_v58 = vand.u32 4294901760, %v4062_v59  ;;  %v11957_v62 = vand.u32 4294901760, %v11098_v28 }
 0x471   : > { %12103 = vst [vmem:[#allocation18_spill] sm:$0xff] %v11108_v1  ;;  %v11118_v0 = vsub.f32 %v3967_v40, %v11105_v49  ;;  %v3969_v36 = vmul.f32 %v11108_v1, %v11108_v1  ;;  %v4092_v34 = vsub.f32 %v11093_v12, %v11956_v47  ;;  %v12108_v40 = vld [vmem:[#allocation33_spill] sm:$0xff]  ;;  %v12113_v47 = vld [vmem:[#allocation36_spill] sm:$0xff] }
 0x472   : > { %12105 = vst [vmem:[#allocation12_spill] sm:$0xff] %v11114_v43  ;;  %v11126_v4 = vsub.f32 %v3966_v57, %v11111_v21  ;;  %v3968_v24 = vmul.f32 %v11114_v43, %v11114_v43  ;;  %v8031_v30 = vpop.f32.mrb[24].mxu0  ;;  %8073 = vmatprep.mubr.f32.mxu1 %v4063_v58  ;;  %v4082_v27 = vsub.f32 %v11098_v28, %v11957_v62  ;;  %v12110_v58 = vld [vmem:[#allocation26_spill] sm:$0xff] }
 0x473   : > { %v11133_v9 = vand.u32 4294901760, %v3969_v36  ;;  %v11136_v51 = vsub.f32 %v12106_v37, %v8031_v30  ;;  %v3900_v50 = vpop.f32.mrb[25].mxu0  ;;  %8074 = vmatmul.mubr.f32.vlgmr.msra.gmra.mrb[32].mxu1 %v4073_v39  ;;  %v11955_v14 = vand.u32 4294901760, %v11118_v0  ;;  %v4093_v20 = vand.u32 4294901760, %v4092_v34  ;;  %v12111_v34 = vld [vmem:[#allocation35_spill] sm:$0xff] }
 0x474   : > { %v11139_v15 = vand.u32 4294901760, %v3968_v24  ;;  %v11142_v57 = vsub.f32 %v12108_v40, %v3900_v50  ;;  %8808 = vmatpush3.bf16.msra.mxu1 %v12079_v63  ;;  %v4083_v3 = vand.u32 4294901760, %v4082_v27  ;;  %v11959_v59 = vand.u32 4294901760, %v11126_v4 }
 0x475   : > { %12107 = vst [vmem:[#allocation22_spill] sm:$0xff] %v11136_v51  ;;  %v11147_v2 = vsub.f32 %v3969_v36, %v11133_v9  ;;  %v3971_v25 = vmul.f32 %v11136_v51, %v11136_v51  ;;  %8810 = vmatprep.subr.bf16.mxu1 %v12110_v58  ;;  %v4112_v39 = vsub.f32 %v11118_v0, %v11955_v14  ;;  %v12118_v51 = vld [vmem:[#allocation39_spill] sm:$0xff] }
 0x476   : > { %12109 = vst [vmem:[#allocation23_spill] sm:$0xff] %v11142_v57  ;;  %v11156_v30 = vsub.f32 %v3968_v24, %v11139_v15  ;;  %v3970_v63 = vmul.f32 %v11142_v57, %v11142_v57  ;;  %v8034_v27 = vpop.f32.mrb[26].mxu0  ;;  %8076 = vmatprep.mubr.f32.mxu1 %v4083_v3  ;;  %v4102_v36 = vsub.f32 %v11126_v4, %v11959_v59 }
 0x477   : > { %v11163_v37 = vand.u32 4294901760, %v3971_v25  ;;  %v11166_v50 = vsub.f32 %v12111_v34, %v8034_v27  ;;  %v3912_v40 = vpop.f32.mrb[27].mxu0  ;;  %8077 = vmatmul.mubr.f32.gmra.mrb[34].mxu1 %v4093_v20  ;;  %v11963_v14 = vand.u32 4294901760, %v11147_v2  ;;  %v4113_v34 = vand.u32 4294901760, %v4112_v39  ;;  %v12115_v20 = vld [vmem:[#allocation28_spill] sm:$0xff]  ;;  %v12116_v39 = vld [vmem:[#allocation38_spill] sm:$0xff] }
 0x478   : > { %v11169_v24 = vand.u32 4294901760, %v3970_v63  ;;  %v11172_v62 = vsub.f32 %v12113_v47, %v3912_v40  ;;  %8812 = vmatpush3.bf16.msra.mxu1 %v12110_v58  ;;  %v4103_v3 = vand.u32 4294901760, %v4102_v36  ;;  %v11967_v10 = vand.u32 4294901760, %v11156_v30 }
 0x479   : > { %12112 = vst [vmem:[#allocation24_spill] sm:$0xff] %v11166_v50  ;;  %v11177_v59 = vsub.f32 %v3971_v25, %v11163_v37  ;;  %v3973_v27 = vmul.f32 %v11166_v50, %v11166_v50  ;;  %8814 = vmatprep.subr.bf16.mxu1 %v12115_v20  ;;  %v4132_v44 = vsub.f32 %v11147_v2, %v11963_v14 }
 0x47a   : > { %12114 = vst [vmem:[#allocation25_spill] sm:$0xff] %v11172_v62  ;;  %v11186_v47 = vsub.f32 %v3970_v63, %v11169_v24  ;;  %v3972_v58 = vmul.f32 %v11172_v62, %v11172_v62  ;;  %v8037_v36 = vpop.f32.mrb[28].mxu0  ;;  %8079 = vmatprep.mubr.f32.mxu1 %v4103_v3  ;;  %v4122_v25 = vsub.f32 %v11156_v30, %v11967_v10 }
 0x47b   : > { %v11193_v40 = vand.u32 4294901760, %v3973_v27  ;;  %v11196_v50 = vsub.f32 %v12116_v39, %v8037_v36  ;;  %v3924_v57 = vpop.f32.mrb[29].mxu0  ;;  %8080 = vmatmul.mubr.f32.gmra.mrb[36].mxu1 %v4113_v34  ;;  %v11971_v14 = vand.u32 4294901760, %v11177_v59  ;;  %v4133_v39 = vand.u32 4294901760, %v4132_v44  ;;  %v12120_v34 = vld [vmem:[#allocation34_spill] sm:$0xff]  ;;  %v12121_v44 = vld [vmem:[#allocation40_spill] sm:$0xff] }
 0x47c   : > { %v11199_v63 = vand.u32 4294901760, %v3972_v58  ;;  %v11202_v43 = vsub.f32 %v12118_v51, %v3924_v57  ;;  %8816 = vmatpush3.bf16.msra.mxu1 %v12115_v20  ;;  %v4123_v3 = vand.u32 4294901760, %v4122_v25  ;;  %v11974_v62 = vand.u32 4294901760, %v11186_v47 }
 0x47d   : > { %12117 = vst [vmem:[#allocation27_spill] sm:$0xff] %v11196_v50  ;;  %v11207_v10 = vsub.f32 %v3973_v27, %v11193_v40  ;;  %v3975_v36 = vmul.f32 %v11196_v50, %v11196_v50  ;;  %8818 = vmatprep.subr.bf16.mxu1 %v12120_v34  ;;  %v4152_v1 = vsub.f32 %v11177_v59, %v11971_v14 }
 0x47e   : > { %12119 = vst [vmem:[#allocation29_spill] sm:$0xff] %v11202_v43  ;;  %v11216_v51 = vsub.f32 %v3972_v58, %v11199_v63  ;;  %v3974_v57 = vmul.f32 %v11202_v43, %v11202_v43  ;;  %v8040_v20 = vpop.f32.mrb[30].mxu0  ;;  %8082 = vmatprep.mubr.f32.mxu1 %v4123_v3  ;;  %v4142_v27 = vsub.f32 %v11186_v47, %v11974_v62 }
 0x47f   : > { %v11223_v25 = vand.u32 4294901760, %v3975_v36  ;;  %v11226_v50 = vsub.f32 %v12121_v44, %v8040_v20  ;;  %v3936_v22 = vpop.f32.mrb[31].mxu0  ;;  %8083 = vmatmul.mubr.f32.gmra.mrb[38].mxu1 %v4133_v39  ;;  %v11976_v14 = vand.u32 4294901760, %v11207_v10  ;;  %v4153_v44 = vand.u32 4294901760, %v4152_v1  ;;  %v12124_v39 = vld [vmem:[#allocation37_spill] sm:$0xff] }
 0x480   : > { %v11229_v58 = vand.u32 4294901760, %v3974_v57  ;;  %v11232_v56 = vsub.f32 %v10478_v35, %v3936_v22  ;;  %8820 = vmatpush3.bf16.msra.mxu1 %v12120_v34  ;;  %v4143_v3 = vand.u32 4294901760, %v4142_v27  ;;  %v11978_v43 = vand.u32 4294901760, %v11216_v51 }
 0x481   : > { %12122 = vst [vmem:[#allocation30_spill] sm:$0xff] %v11226_v50  ;;  %v11237_v62 = vsub.f32 %v3975_v36, %v11223_v25  ;;  %v3977_v20 = vmul.f32 %v11226_v50, %v11226_v50  ;;  %8822 = vmatprep.subr.bf16.mxu1 %v12124_v39  ;;  %v4172_v32 = vsub.f32 %v11207_v10, %v11976_v14 }
 0x482   : > { %12123 = vst [vmem:[#allocation31_spill] sm:$0xff] %v11232_v56  ;;  %v11246_v35 = vsub.f32 %v3974_v57, %v11229_v58  ;;  %v3976_v22 = vmul.f32 %v11232_v56, %v11232_v56  ;;  %8085 = vmatprep.mubr.f32.mxu1 %v4143_v3  ;;  %v4162_v36 = vsub.f32 %v11216_v51, %v11978_v43 }
 0x483   : > { %v11253_v34 = vand.u32 4294901760, %v3977_v20  ;;  %8086 = vmatmul.mubr.f32.gmra.mrb[40].mxu1 %v4153_v44  ;;  %v4191_v1 = vand.u32 4294901760, %v11237_v62  ;;  %v4173_v3 = vand.u32 4294901760, %v4172_v32 }
 0x484   : > { %v11256_v27 = vand.u32 4294901760, %v3976_v22  ;;  %8824 = vmatpush3.bf16.msra.mxu1 %v12124_v39  ;;  %v4163_v14 = vand.u32 4294901760, %v4162_v36  ;;  %v4181_v57 = vand.u32 4294901760, %v11246_v35 }
 0x485   : > { %v11261_v50 = vsub.f32 %v3977_v20, %v11253_v34  ;;  %8826 = vmatprep.subr.bf16.mxu1 %v10177_v53  ;;  %v4192_v43 = vsub.f32 %v11237_v62, %v4191_v1 }
 0x486   : > { %v11268_v44 = vsub.f32 %v3976_v22, %v11256_v27  ;;  %8088 = vmatprep.mubr.f32.mxu1 %v4163_v14  ;;  %v4182_v39 = vsub.f32 %v11246_v35, %v4181_v57 }
 0x487   : > { %8089 = vmatmul.mubr.f32.gmra.mrb[42].mxu1 %v4173_v3  ;;  %v4211_v36 = vand.u32 4294901760, %v11261_v50  ;;  %v4193_v56 = vand.u32 4294901760, %v4192_v43  ;;  %v12129_v43 = vld [vmem:[#allocation19_spill] sm:$0xff] }
 0x488   : > { %8828 = vmatpush3.bf16.msra.mxu1 %v10177_v53  ;;  %v4183_v32 = vand.u32 4294901760, %v4182_v39  ;;  %v4201_v20 = vand.u32 4294901760, %v11268_v44  ;;  %v12130_v39 = vld [vmem:[#allocation20_spill] sm:$0xff] }
 0x489   : > { %8830 = vmatprep.subr.bf16.mxu1 %v10191_v48  ;;  %v4212_v22 = vsub.f32 %v11261_v50, %v4211_v36 }
 0x48a   : > { %8091 = vmatprep.mubr.f32.mxu1 %v4183_v32  ;;  %v4202_v14 = vsub.f32 %v11268_v44, %v4201_v20  ;;  %v12131_v32 = vld [vmem:[#allocation21_spill] sm:$0xff] }
 0x48b   : > { %8092 = vmatmul.mubr.f32.gmra.mrb[44].mxu1 %v4193_v56  ;;  %v4213_v53 = vand.u32 4294901760, %v4212_v22  ;;  %v12125_v56 = vld [vmem:[#allocation41_spill] sm:$0xff]  ;;  %v12132_v22 = vand.u32 4294901760, %v11073_v13 }
 0x48c   : > { %8832 = vmatpush3.bf16.msra.mxu1 %v10191_v48  ;;  %v4203_v3 = vand.u32 4294901760, %v4202_v14  ;;  %v12126_v48 = vld [vmem:[#allocation42_spill] sm:$0xff]  ;;  %v12133_v14 = vand.u32 4294901760, %v11068_v33 }
 0x48d   : > { %8834 = vmatprep.subr.bf16.mxu1 %v10199_v19 }
 0x48e   : > { %8094 = vmatprep.mubr.f32.mxu1 %v4203_v3  ;;  %v12134_v3 = vand.u32 4294901760, %v11098_v28 }
 0x48f   : > { %8095 = vmatmul.mubr.f32.gmra.mrb[46].mxu1 %v4213_v53  ;;  %v12135_v53 = vand.u32 4294901760, %v11093_v12 }
 0x490   : > { %8836 = vmatpush3.bf16.msra.mxu1 %v10199_v19  ;;  %8129 = vmatprep.mubr.f32.mxu1 %v11062_v46  ;;  %v12127_v19 = vld [vmem:[#allocation43_spill] sm:$0xff] }
 0x491   : > { %8838 = vmatprep.subr.bf16.mxu1 %v10203_v41 }
 0x493   : > { %8130 = vmatmul.mubr.f32.vlgmr.msra.gmra.mrb[32].mxu1 %v11057_v26 }
 0x494   : > { %8132 = vmatprep.mubr.f32.mxu1 %v11083_v23  ;;  %8840 = vmatpush3.bf16.msra.mxu1 %v10203_v41  ;;  %v12128_v41 = vld [vmem:[#allocation44_spill] sm:$0xff] }
 0x495   : > { %8842 = vmatprep.subr.bf16.mxu1 %v12125_v56 }
 0x497   : > { %8133 = vmatmul.mubr.f32.gmra.mrb[34].mxu1 %v11078_v52 }
 0x498   : > { %8135 = vmatprep.mubr.f32.mxu1 %v11111_v21  ;;  %8844 = vmatpush3.bf16.msra.mxu1 %v12125_v56  ;;  %v12136_v56 = vand.u32 4294901760, %v11126_v4 }
 0x499   : > { %8846 = vmatprep.subr.bf16.mxu1 %v12126_v48 }
 0x49b   : > { %8136 = vmatmul.mubr.f32.gmra.mrb[36].mxu1 %v11105_v49 }
 0x49c   : > { %8138 = vmatprep.mubr.f32.mxu1 %v11139_v15  ;;  %8848 = vmatpush3.bf16.msra.mxu1 %v12126_v48  ;;  %v12146_v48 = vld [vmem:[#allocation10_spill] sm:$0xff] }
 0x49d   : > { %8850 = vmatprep.subr.bf16.mxu1 %v12127_v19 }
 0x49f   : > { %8139 = vmatmul.mubr.f32.gmra.mrb[38].mxu1 %v11133_v9 }
 0x4a0   : > { %8141 = vmatprep.mubr.f32.mxu1 %v11169_v24  ;;  %8852 = vmatpush3.bf16.msra.mxu1 %v12127_v19 }
 0x4a1   : > { %8854 = vmatprep.subr.bf16.mxu1 %v12128_v41 }
 0x4a3   : > { %8142 = vmatmul.mubr.f32.gmra.mrb[40].mxu1 %v11163_v37 }
 0x4a4   : > { %8144 = vmatprep.mubr.f32.mxu1 %v11199_v63  ;;  %8856 = vmatpush3.bf16.msra.mxu1 %v12128_v41 }
 0x4a5   : > { %8858 = vmatprep.subr.bf16.mxu1 %v12129_v43 }
 0x4a7   : > { %8145 = vmatmul.mubr.f32.gmra.mrb[42].mxu1 %v11193_v40 }
 0x4a8   : > { %8147 = vmatprep.mubr.f32.mxu1 %v11229_v58  ;;  %8860 = vmatpush3.bf16.msra.mxu1 %v12129_v43 }
 0x4a9   : > { %8862 = vmatprep.subr.bf16.mxu1 %v12130_v39 }
 0x4ab   : > { %8148 = vmatmul.mubr.f32.gmra.mrb[44].mxu1 %v11223_v25 }
 0x4ac   : > { %8150 = vmatprep.mubr.f32.mxu1 %v11256_v27  ;;  %8864 = vmatpush3.bf16.msra.mxu1 %v12130_v39 }
 0x4ad   : > { %8866 = vmatprep.subr.bf16.mxu1 %v12131_v32 }
 0x4af   : > { %8151 = vmatmul.mubr.f32.gmra.mrb[46].mxu1 %v11253_v34 }
 0x4b0   : > { %8868 = vmatpush3.bf16.msra.mxu1 %v12131_v32  ;;  %8185 = vmatprep.mubr.f32.mxu1 %v11073_v13  ;;  %v12137_v13 = vld [vmem:[#allocation8_spill] sm:$0xff] }
 0x4b1   : > { %8870 = vmatprep.subr.bf16.mxu1 %v9964_v11 }
 0x4b3   : > { %8186 = vmatmul.mubr.f32.vlgmr.msra.gmra.mrb[32].mxu1 %v11068_v33  ;;  %v12138_v33 = vand.u32 4294901760, %v11118_v0 }
 0x4b4   : > { %8188 = vmatprep.mubr.f32.mxu1 %v11098_v28  ;;  %8872 = vmatpush3.bf16.msra.mxu1 %v9964_v11  ;;  %v12139_v28 = vand.u32 4294901760, %v11156_v30 }
 0x4b5   : > { %8874 = vmatprep.subr.bf16.mxu1 %v10023_v18 }
 0x4b7   : > { %8189 = vmatmul.mubr.f32.gmra.mrb[34].mxu1 %v11093_v12  ;;  %v12141_v12 = vand.u32 4294901760, %v11147_v2 }
 0x4b8   : > { %8191 = vmatprep.mubr.f32.mxu1 %v11126_v4  ;;  %8876 = vmatpush3.bf16.msra.mxu1 %v10023_v18  ;;  %v12142_v4 = vand.u32 4294901760, %v11186_v47 }
 0x4b9   : > { %8878 = vmatprep.subr.bf16.mxu1 %v10047_v16 }
 0x4bb   : > { %8192 = vmatmul.mubr.f32.gmra.mrb[36].mxu1 %v11118_v0  ;;  %v12144_v0 = vand.u32 4294901760, %v11177_v59 }
 0x4bc   : > { %8194 = vmatprep.mubr.f32.mxu1 %v11156_v30  ;;  %8880 = vmatpush3.bf16.msra.mxu1 %v10047_v16  ;;  %v12145_v30 = vand.u32 4294901760, %v11216_v51 }
 0x4bd   : > { %8882 = vmatprep.subr.bf16.mxu1 %v10071_v29 }
 0x4bf   : > { %8195 = vmatmul.mubr.f32.gmra.mrb[38].mxu1 %v11147_v2  ;;  %v12147_v2 = vand.u32 4294901760, %v11207_v10 }
 0x4c0   : > { %8197 = vmatprep.mubr.f32.mxu1 %v11186_v47  ;;  %8884 = vmatpush3.bf16.msra.mxu1 %v10071_v29  ;;  %v12148_v47 = vld [vmem:[#allocation13_spill] sm:$0xff] }
 0x4c1   : > { %8886 = vmatprep.subr.bf16.mxu1 %v10085_v38 }
 0x4c3   : > { %8198 = vmatmul.mubr.f32.gmra.mrb[40].mxu1 %v11177_v59  ;;  %v12149_v59 = vld [vmem:[#allocation14_spill] sm:$0xff] }
 0x4c4   : > { %8200 = vmatprep.mubr.f32.mxu1 %v11216_v51  ;;  %8888 = vmatpush3.bf16.msra.mxu1 %v10085_v38 }
 0x4c5   : > { %8890 = vmatprep.subr.bf16.mxu1 %v10114_v61 }
 0x4c7   : > { %8201 = vmatmul.mubr.f32.gmra.mrb[42].mxu1 %v11207_v10 }
 0x4c8   : > { %8203 = vmatprep.mubr.f32.mxu1 %v11246_v35  ;;  %8892 = vmatpush3.bf16.msra.mxu1 %v10114_v61 }
 0x4c9   : > { %8894 = vmatprep.subr.bf16.mxu1 %v12031_v17 }
 0x4cb   : > { %8204 = vmatmul.mubr.f32.gmra.mrb[44].mxu1 %v11237_v62 }
 0x4cc   : > { %8206 = vmatprep.mubr.f32.mxu1 %v11268_v44  ;;  %8896 = vmatpush3.bf16.msra.mxu1 %v12031_v17 }
 0x4cd   : > { %8898 = vmatprep.subr.bf16.mxu1 %v12032_v42 }
 0x4cf   : > { %8207 = vmatmul.mubr.f32.gmra.mrb[46].mxu1 %v11261_v50 }
 0x4d0   : > { %8900 = vmatpush3.bf16.msra.mxu1 %v12032_v42  ;;  %8241 = vmatprep.mubr.f32.mxu1 %v12132_v22 }
 0x4d1   : > { %8902 = vmatprep.subr.bf16.mxu1 %v10612_v54 }
 0x4d3   : > { %8242 = vmatmul.mubr.f32.vlgmr.msra.gmra.mrb[32].mxu1 %v12133_v14 }
 0x4d4   : > { %8244 = vmatprep.mubr.f32.mxu1 %v12134_v3  ;;  %8904 = vmatpush3.bf16.msra.mxu1 %v10612_v54  ;;  %v12140_v54 = vld [vmem:[#allocation11_spill] sm:$0xff] }
 0x4d5   : > { %8906 = vmatprep.subr.bf16.mxu1 %v10623_v6 }
 0x4d7   : > { %8245 = vmatmul.mubr.f32.gmra.mrb[34].mxu1 %v12135_v53 }
 0x4d8   : > { %8247 = vmatprep.mubr.f32.mxu1 %v12136_v56  ;;  %8908 = vmatpush3.bf16.msra.mxu1 %v10623_v6  ;;  %v12143_v6 = vld [vmem:[#allocation9_spill] sm:$0xff] }
 0x4d9   : > { %8910 = vmatprep.subr.bf16.mxu1 %v12137_v13 }
 0x4db   : > { %8248 = vmatmul.mubr.f32.gmra.mrb[36].mxu1 %v12138_v33 }
 0x4dc   : > { %8250 = vmatprep.mubr.f32.mxu1 %v12139_v28  ;;  %8912 = vmatpush3.bf16.msra.mxu1 %v12137_v13 }
 0x4dd   : > { %8914 = vmatprep.subr.bf16.mxu1 %v12140_v54 }
 0x4df   : > { %8251 = vmatmul.mubr.f32.gmra.mrb[38].mxu1 %v12141_v12 }
 0x4e0   : > { %8253 = vmatprep.mubr.f32.mxu1 %v12142_v4  ;;  %8916 = vmatpush3.bf16.msra.mxu1 %v12140_v54 }
 0x4e1   : > { %8918 = vmatprep.subr.bf16.mxu1 %v12143_v6 }
 0x4e3   : > { %8254 = vmatmul.mubr.f32.gmra.mrb[40].mxu1 %v12144_v0 }
 0x4e4   : > { %8256 = vmatprep.mubr.f32.mxu1 %v12145_v30  ;;  %8920 = vmatpush3.bf16.msra.mxu1 %v12143_v6 }
 0x4e5   : > { %8922 = vmatprep.subr.bf16.mxu1 %v12146_v48 }
 0x4e7   : > { %8257 = vmatmul.mubr.f32.gmra.mrb[42].mxu1 %v12147_v2 }
 0x4e8   : > { %8259 = vmatprep.mubr.f32.mxu1 %v4181_v57  ;;  %8924 = vmatpush3.bf16.msra.mxu1 %v12146_v48 }
 0x4e9   : > { %8926 = vmatprep.subr.bf16.mxu1 %v12148_v47 }
 0x4eb   : > { %8260 = vmatmul.mubr.f32.gmra.mrb[44].mxu1 %v4191_v1 }
 0x4ec   : > { %8262 = vmatprep.mubr.f32.mxu1 %v4201_v20  ;;  %8928 = vmatpush3.bf16.msra.mxu1 %v12148_v47 }
 0x4ed   : > { %8930 = vmatprep.subr.bf16.mxu1 %v12149_v59 }
 0x4ef   : > { %8263 = vmatmul.mubr.f32.gmra.mrb[46].mxu1 %v4211_v36 }
 0x4f0   : > { %8932 = vmatpush3.bf16.msra.mxu1 %v12149_v59  ;;  %8297 = vmatprep.mubr.f32.mxu1 %v11062_v46 }
 0x4f1   : > { %8934 = vmatprep.subr.bf16.mxu1 %v9964_v11 }
 0x4f3   : > { %8298 = vmatmul.mubr.f32.vlgmr.msra.gmra.mrb[32].mxu1 %v11057_v26 }
 0x4f4   : > { %8300 = vmatprep.mubr.f32.mxu1 %v11083_v23  ;;  %8936 = vmatpush3.bf16.msra.mxu1 %v9964_v11 }
 0x4f5   : > { %8938 = vmatprep.subr.bf16.mxu1 %v10023_v18 }
 0x4f7   : > { %8301 = vmatmul.mubr.f32.gmra.mrb[34].mxu1 %v11078_v52 }
 0x4f8   : > { %8303 = vmatprep.mubr.f32.mxu1 %v11111_v21  ;;  %8940 = vmatpush3.bf16.msra.mxu1 %v10023_v18 }
 0x4f9   : > { %8942 = vmatprep.subr.bf16.mxu1 %v10047_v16 }
 0x4fb   : > { %8304 = vmatmul.mubr.f32.gmra.mrb[36].mxu1 %v11105_v49 }
 0x4fc   : > { %8306 = vmatprep.mubr.f32.mxu1 %v11139_v15  ;;  %8944 = vmatpush3.bf16.msra.mxu1 %v10047_v16 }
 0x4fd   : > { %8946 = vmatprep.subr.bf16.mxu1 %v10071_v29 }
 0x4ff   : > { %8307 = vmatmul.mubr.f32.gmra.mrb[38].mxu1 %v11133_v9 }
 0x500   : > { %8309 = vmatprep.mubr.f32.mxu1 %v11169_v24  ;;  %8948 = vmatpush3.bf16.msra.mxu1 %v10071_v29 }
 0x501   : > { %8950 = vmatprep.subr.bf16.mxu1 %v10085_v38 }
 0x503   : > { %8310 = vmatmul.mubr.f32.gmra.mrb[40].mxu1 %v11163_v37 }
 0x504   : > { %8312 = vmatprep.mubr.f32.mxu1 %v11199_v63  ;;  %8952 = vmatpush3.bf16.msra.mxu1 %v10085_v38 }
 0x505   : > { %8954 = vmatprep.subr.bf16.mxu1 %v10114_v61 }
 0x507   : > { %8313 = vmatmul.mubr.f32.gmra.mrb[42].mxu1 %v11193_v40 }
 0x508   : > { %8315 = vmatprep.mubr.f32.mxu1 %v11229_v58  ;;  %8956 = vmatpush3.bf16.msra.mxu1 %v10114_v61 }
 0x509   : > { %8958 = vmatprep.subr.bf16.mxu1 %v12031_v17 }
 0x50b   : > { %8316 = vmatmul.mubr.f32.gmra.mrb[44].mxu1 %v11223_v25 }
 0x50c   : > { %8318 = vmatprep.mubr.f32.mxu1 %v11256_v27  ;;  %8960 = vmatpush3.bf16.msra.mxu1 %v12031_v17 }
 0x50d   : > { %8962 = vmatprep.subr.bf16.mxu1 %v12032_v42 }
 0x50f   : > { %8319 = vmatmul.mubr.f32.gmra.mrb[46].mxu1 %v11253_v34 }
 0x510   : > { %8964 = vmatpush3.bf16.msra.mxu1 %v12032_v42  ;;  %8353 = vmatprep.mubr.f32.mxu1 %v11062_v46 }
 0x513   : > { %8354 = vmatmul.mubr.f32.vlgmr.msra.gmra.mrb[32].mxu1 %v11057_v26 }
 0x514   : > { %8356 = vmatprep.mubr.f32.mxu1 %v11083_v23 }
 0x517   : > { %8357 = vmatmul.mubr.f32.gmra.mrb[34].mxu1 %v11078_v52 }
 0x518   : > { %8359 = vmatprep.mubr.f32.mxu1 %v11111_v21 }
 0x51b   : > { %8360 = vmatmul.mubr.f32.gmra.mrb[36].mxu1 %v11105_v49 }
 0x51c   : > { %8362 = vmatprep.mubr.f32.mxu1 %v11139_v15 }
 0x51f   : > { %8363 = vmatmul.mubr.f32.gmra.mrb[38].mxu1 %v11133_v9 }
 0x520   : > { %8365 = vmatprep.mubr.f32.mxu1 %v11169_v24 }
 0x523   : > { %8366 = vmatmul.mubr.f32.gmra.mrb[40].mxu1 %v11163_v37 }
 0x524   : > { %8368 = vmatprep.mubr.f32.mxu1 %v11199_v63 }
 0x527   : > { %8369 = vmatmul.mubr.f32.gmra.mrb[42].mxu1 %v11193_v40 }
 0x528   : > { %8371 = vmatprep.mubr.f32.mxu1 %v11229_v58 }
 0x52b   : > { %8372 = vmatmul.mubr.f32.gmra.mrb[44].mxu1 %v11223_v25 }
 0x52c   : > { %8374 = vmatprep.mubr.f32.mxu1 %v11256_v27 }
 0x52f   : > { %8375 = vmatmul.mubr.f32.gmra.mrb[46].mxu1 %v11253_v34 }
 0x5e6   : > { %v8355_v11 = vpop.f32.mrb[32].mxu1 }
 0x5e7   : > { %v5265_v18 = vmul.f32 0.03125, %v8355_v11  ;;  %v5170_v16 = vpop.f32.mrb[33].mxu1 }
 0x5e8   : > { %v5264_v29 = vmul.f32 0.03125, %v5170_v16 }
 0x5e9   : > { %v5281_v38 = vadd.f32 1e-05, %v5265_v18 }
 0x5ea   : > { %v5280_v61 = vadd.f32 1e-05, %v5264_v29  ;;  %v8358_v17 = vpop.f32.mrb[34].mxu1 }
 0x5eb   : > { %9436 = vrsqrt.f32 %v5281_v38  ;;  %v5267_v42 = vmul.f32 0.03125, %v8358_v17  ;;  %v5182_v26 = vpop.f32.mrb[35].mxu1 }
 0x5ec   : > { %9438 = vrsqrt.f32 %v5280_v61  ;;  %v5266_v46 = vmul.f32 0.03125, %v5182_v26 }
 0x5ed   : > { %v5283_v10 = vadd.f32 1e-05, %v5267_v42 }
 0x5ee   : > { %v5282_v52 = vadd.f32 1e-05, %v5266_v46  ;;  %v8361_v23 = vpop.f32.mrb[36].mxu1 }
 0x5ef   : > { %9440 = vrsqrt.f32 %v5283_v10  ;;  %v5269_v49 = vmul.f32 0.03125, %v8361_v23  ;;  %v5194_v21 = vpop.f32.mrb[37].mxu1 }
 0x5f0   : > { %9442 = vrsqrt.f32 %v5282_v52  ;;  %v5268_v62 = vmul.f32 0.03125, %v5194_v21 }
 0x5f1   : > { %v5285_v9 = vadd.f32 1e-05, %v5269_v49 }
 0x5f2   : > { %v5284_v15 = vadd.f32 1e-05, %v5268_v62  ;;  %v8364_v37 = vpop.f32.mrb[38].mxu1 }
 0x5f3   : > { %9444 = vrsqrt.f32 %v5285_v9  ;;  %v5271_v50 = vmul.f32 0.03125, %v8364_v37  ;;  %v5206_v24 = vpop.f32.mrb[39].mxu1 }
 0x5f4   : > { %9446 = vrsqrt.f32 %v5284_v15  ;;  %v5270_v40 = vmul.f32 0.03125, %v5206_v24 }
 0x5f5   : > { %v9437_v63 = vpop.eup %9436  ;;  %v5287_v51 = vadd.f32 1e-05, %v5271_v50 }
 0x5f6   : > { %v9439_v25 = vpop.eup %9438  ;;  %v5316_v58 = vsel %vm2802_vm2, %v9437_v63, 0  ;;  %v5286_v35 = vadd.f32 1e-05, %v5270_v40  ;;  %v8367_v34 = vpop.f32.mrb[40].mxu1 }
 0x5f7   : > { %v11447_v1 = vand.u32 4294901760, %v5316_v58  ;;  %9448 = vrsqrt.f32 %v5287_v51  ;;  %v5273_v27 = vmul.f32 0.03125, %v8367_v34  ;;  %v5218_v57 = vpop.f32.mrb[41].mxu1  ;;  %v5313_v44 = vsel %vm2802_vm2, %v9439_v25, 0 }
 0x5f8   : > { %9450 = vrsqrt.f32 %v5286_v35  ;;  %v5272_v36 = vmul.f32 0.03125, %v5218_v57  ;;  %v11450_v20 = vand.u32 4294901760, %v5313_v44 }
 0x5f9   : > { %v9441_v19 = vpop.eup %9440  ;;  %v11453_v41 = vsub.f32 %v5316_v58, %v11447_v1  ;;  %v5289_v43 = vadd.f32 1e-05, %v5273_v27 }
 0x5fa   : > { %v9443_v39 = vpop.eup %9442  ;;  %v5288_v32 = vadd.f32 1e-05, %v5272_v36  ;;  %v8370_v22 = vpop.f32.mrb[42].mxu1  ;;  %v11456_v14 = vsub.f32 %v5313_v44, %v11450_v20  ;;  %v5322_v3 = vsel %vm2802_vm2, %v9441_v19, 0 }
 0x5fb   : > { %9452 = vrsqrt.f32 %v5289_v43  ;;  %v5275_v53 = vmul.f32 0.03125, %v8370_v22  ;;  %v5230_v56 = vpop.f32.mrb[43].mxu1  ;;  %v5438_v13 = vand.u32 4294901760, %v11453_v41  ;;  %v5319_v33 = vsel %vm2802_vm2, %v9443_v39, 0 }
 0x5fc   : > { %9454 = vrsqrt.f32 %v5288_v32  ;;  %v5274_v28 = vmul.f32 0.03125, %v5230_v56  ;;  %v5428_v54 = vand.u32 4294901760, %v11456_v14  ;;  %v11462_v12 = vand.u32 4294901760, %v5319_v33 }
 0x5fd   : > { %v9445_v4 = vpop.eup %9444  ;;  %v5291_v6 = vadd.f32 1e-05, %v5275_v53  ;;  %v5439_v0 = vsub.f32 %v11453_v41, %v5438_v13  ;;  %v11467_v30 = vand.u32 4294901760, %v5322_v3 }
 0x5fe   : > { %v9447_v48 = vpop.eup %9446  ;;  %v5290_v2 = vadd.f32 1e-05, %v5274_v28  ;;  %v8373_v47 = vpop.f32.mrb[44].mxu1  ;;  %v5429_v59 = vsub.f32 %v11456_v14, %v5428_v54  ;;  %v11473_v11 = vsub.f32 %v5319_v33, %v11462_v12  ;;  %v5328_v18 = vsel %vm2802_vm2, %v9445_v4, 0 }
 0x5ff   : > { %9456 = vrsqrt.f32 %v5291_v6  ;;  %v5277_v16 = vmul.f32 0.03125, %v8373_v47  ;;  %v5242_v29 = vpop.f32.mrb[45].mxu1  ;;  %v5440_v38 = vand.u32 4294901760, %v5439_v0  ;;  %v11477_v61 = vsub.f32 %v5322_v3, %v11467_v30 }
 0x600   : > { %9458 = vrsqrt.f32 %v5290_v2  ;;  %v5276_v17 = vmul.f32 0.03125, %v5242_v29  ;;  %v5430_v42 = vand.u32 4294901760, %v5429_v59  ;;  %v5448_v26 = vand.u32 4294901760, %v11473_v11 }
 0x601   : > { %v9449_v46 = vpop.eup %9448  ;;  %v5293_v10 = vadd.f32 1e-05, %v5277_v16  ;;  %v5458_v52 = vand.u32 4294901760, %v11477_v61  ;;  %v5325_v23 = vsel %vm2802_vm2, %v9447_v48, 0  ;;  %v11482_v49 = vand.u32 4294901760, %v5328_v18 }
 0x602   : > { %v9451_v21 = vpop.eup %9450  ;;  %v5292_v62 = vadd.f32 1e-05, %v5276_v17  ;;  %v8376_v9 = vpop.f32.mrb[46].mxu1  ;;  %8379 = vmatprep.mubr.f32.mxu0 %v5430_v42  ;;  %v5449_v15 = vsub.f32 %v11473_v11, %v5448_v26  ;;  %v11487_v37 = vand.u32 4294901760, %v5325_v23  ;;  %v5334_v50 = vsel %vm2802_vm2, %v9449_v46, 0 }
 0x603   : > { %9460 = vrsqrt.f32 %v5293_v10  ;;  %v5279_v24 = vmul.f32 0.03125, %v8376_v9  ;;  %v5254_v40 = vpop.f32.mrb[47].mxu1  ;;  %8380 = vmatmul.mubr.f32.vlgmr.msra.gmra.mrb[32].mxu0 %v5440_v38  ;;  %v5459_v63 = vsub.f32 %v11477_v61, %v5458_v52  ;;  %v11494_v51 = vsub.f32 %v5328_v18, %v11482_v49 }
 0x604   : > { %9462 = vrsqrt.f32 %v5292_v62  ;;  %v5278_v25 = vmul.f32 0.03125, %v5254_v40  ;;  %8404 = vmatpush3.msra.mxu0 %v10780_v55  ;;  %v5450_v58 = vand.u32 4294901760, %v5449_v15  ;;  %v11498_v35 = vsub.f32 %v5325_v23, %v11487_v37 }
 0x605   : > { %v9453_v34 = vpop.eup %9452  ;;  %v5295_v27 = vadd.f32 1e-05, %v5279_v24  ;;  %v5460_v57 = vand.u32 4294901760, %v5459_v63  ;;  %v5478_v44 = vand.u32 4294901760, %v11494_v51  ;;  %v5331_v36 = vsel %vm2802_vm2, %v9451_v21, 0  ;;  %8429 = vmatprep.subr.mxu0 %v10773_v7 }
 0x606   : > { %v9455_v19 = vpop.eup %9454  ;;  %v5294_v43 = vadd.f32 1e-05, %v5278_v25  ;;  %8382 = vmatprep.mubr.f32.mxu0 %v5450_v58  ;;  %v5468_v39 = vand.u32 4294901760, %v11498_v35  ;;  %v11504_v32 = vand.u32 4294901760, %v5331_v36  ;;  %v11506_v55 = vand.u32 4294901760, %v5334_v50 }
 0x607   : > { %9464 = vrsqrt.f32 %v5295_v27  ;;  %8383 = vmatmul.mubr.f32.gmra.mrb[34].mxu0 %v5460_v57  ;;  %v5479_v22 = vsub.f32 %v11494_v51, %v5478_v44  ;;  %v5337_v3 = vsel %vm2802_vm2, %v9455_v19, 0  ;;  %v5340_v53 = vsel %vm2802_vm2, %v9453_v34, 0 }
 0x608   : > { %9466 = vrsqrt.f32 %v5294_v43  ;;  %v5469_v56 = vsub.f32 %v11498_v35, %v5468_v39  ;;  %v11517_v33 = vsub.f32 %v5331_v36, %v11504_v32  ;;  %v11520_v28 = vsub.f32 %v5334_v50, %v11506_v55 }
 0x609   : > { %v9457_v4 = vpop.eup %9456  ;;  %v5480_v6 = vand.u32 4294901760, %v5479_v22  ;;  %v11522_v0 = vand.u32 4294901760, %v5337_v3  ;;  %v11524_v48 = vand.u32 4294901760, %v5340_v53 }
 0x60a   : > { %v9459_v2 = vpop.eup %9458  ;;  %v5470_v47 = vand.u32 4294901760, %v5469_v56  ;;  %v5488_v59 = vand.u32 4294901760, %v11517_v33  ;;  %v5498_v18 = vand.u32 4294901760, %v11520_v28  ;;  %v5346_v16 = vsel %vm2802_vm2, %v9457_v4, 0 }
 0x60b   : > { %v11530_v29 = vsub.f32 %v5337_v3, %v11522_v0  ;;  %v11533_v38 = vsub.f32 %v5340_v53, %v11524_v48  ;;  %v5343_v17 = vsel %vm2802_vm2, %v9459_v2, 0  ;;  %v11536_v42 = vand.u32 4294901760, %v5346_v16 }
 0x60c   : > { %8385 = vmatprep.mubr.f32.mxu0 %v5470_v47  ;;  %v5489_v46 = vsub.f32 %v11517_v33, %v5488_v59  ;;  %v5499_v10 = vsub.f32 %v11520_v28, %v5498_v18  ;;  %v11544_v23 = vand.u32 4294901760, %v5343_v17 }
 0x60d   : > { %v9461_v21 = vpop.eup %9460  ;;  %8386 = vmatmul.mubr.f32.gmra.mrb[36].mxu0 %v5480_v6  ;;  %v5508_v62 = vand.u32 4294901760, %v11530_v29  ;;  %v5518_v9 = vand.u32 4294901760, %v11533_v38  ;;  %v11549_v15 = vsub.f32 %v5346_v16, %v11536_v42 }
 0x60e   : > { %v9463_v50 = vpop.eup %9462  ;;  %v5490_v24 = vand.u32 4294901760, %v5489_v46  ;;  %v5500_v40 = vand.u32 4294901760, %v5499_v10  ;;  %v11552_v63 = vsub.f32 %v5343_v17, %v11544_v23  ;;  %v5352_v25 = vsel %vm2802_vm2, %v9461_v21, 0 }
 0x60f   : > { %v5509_v58 = vsub.f32 %v11530_v29, %v5508_v62  ;;  %v5519_v34 = vsub.f32 %v11533_v38, %v5518_v9  ;;  %v5538_v27 = vand.u32 4294901760, %v11549_v15  ;;  %v5349_v57 = vsel %vm2802_vm2, %v9463_v50, 0 }
 0x610   : > { %8388 = vmatprep.mubr.f32.mxu0 %v5490_v24  ;;  %v5528_v36 = vand.u32 4294901760, %v11552_v63  ;;  %v11564_v19 = vand.u32 4294901760, %v5349_v57  ;;  %v11566_v43 = vand.u32 4294901760, %v5352_v25 }
 0x611   : > { %v9465_v22 = vpop.eup %9464  ;;  %8389 = vmatmul.mubr.f32.gmra.mrb[38].mxu0 %v5500_v40  ;;  %v5510_v3 = vand.u32 4294901760, %v5509_v58  ;;  %v5520_v47 = vand.u32 4294901760, %v5519_v34  ;;  %v5539_v16 = vsub.f32 %v11549_v15, %v5538_v27 }
 0x612   : > { %v9467_v53 = vpop.eup %9466  ;;  %v5529_v56 = vsub.f32 %v11552_v63, %v5528_v36  ;;  %v11572_v4 = vsub.f32 %v5349_v57, %v11564_v19  ;;  %v11575_v6 = vsub.f32 %v5352_v25, %v11566_v43  ;;  %v5358_v2 = vsel %vm2802_vm2, %v9465_v22, 0 }
 0x613   : > { %8391 = vmatprep.mubr.f32.mxu0 %v5510_v3  ;;  %v5355_v17 = vsel %vm2802_vm2, %v9467_v53, 0  ;;  %v11582_v46 = vand.u32 4294901760, %v5358_v2  ;;  %v5540_v34 = vand.u32 4294901760, %v5539_v16 }
 0x614   : > { %v5530_v10 = vand.u32 4294901760, %v5529_v56  ;;  %v5548_v21 = vand.u32 4294901760, %v11572_v4  ;;  %v5558_v50 = vand.u32 4294901760, %v11575_v6  ;;  %v11586_v24 = vand.u32 4294901760, %v5355_v17 }
 0x615   : > { %8392 = vmatmul.mubr.f32.gmra.mrb[40].mxu0 %v5520_v47  ;;  %v11589_v40 = vsub.f32 %v5358_v2, %v11582_v46 }
 0x616   : > { %8394 = vmatprep.mubr.f32.mxu0 %v5530_v10  ;;  %v5549_v25 = vsub.f32 %v11572_v4, %v5548_v21  ;;  %v11595_v58 = vsub.f32 %v5355_v17, %v11586_v24  ;;  %v5559_v57 = vsub.f32 %v11575_v6, %v5558_v50 }
 0x617   : > { %v5578_v22 = vand.u32 4294901760, %v11589_v40 }
 0x618   : > { %v5550_v3 = vand.u32 4294901760, %v5549_v25  ;;  %v5568_v53 = vand.u32 4294901760, %v11595_v58  ;;  %v5560_v2 = vand.u32 4294901760, %v5559_v57 }
 0x619   : > { %8395 = vmatmul.mubr.f32.gmra.mrb[42].mxu0 %v5540_v34  ;;  %v5579_v47 = vsub.f32 %v11589_v40, %v5578_v22 }
 0x61a   : > { %8397 = vmatprep.mubr.f32.mxu0 %v5550_v3  ;;  %v5569_v56 = vsub.f32 %v11595_v58, %v5568_v53 }
 0x61b   : > { %v5580_v16 = vand.u32 4294901760, %v5579_v47 }
 0x61c   : > { %v5570_v17 = vand.u32 4294901760, %v5569_v56  ;;  %v12159_v56 = vld [vmem:[#allocation27_spill] sm:$0xff] }
 0x61d   : > { %8398 = vmatmul.mubr.f32.gmra.mrb[44].mxu0 %v5560_v2 }
 0x61e   : > { %8400 = vmatprep.mubr.f32.mxu0 %v5570_v17 }
 0x621   : > { %8401 = vmatmul.mubr.f32.gmra.mrb[46].mxu0 %v5580_v16  ;;  %v12160_v16 = vld [vmem:[#allocation29_spill] sm:$0xff] }
 0x622   : > { %8405 = vmatprep.mubr.f32.mxu0 %v11450_v20 }
 0x625   : > { %8406 = vmatmul.mubr.f32.vlgmr.msra.gmra.mrb[32].mxu0 %v11447_v1 }
 0x626   : > { %8408 = vmatprep.mubr.f32.mxu0 %v11462_v12  ;;  %8430 = vmatpush3.msra.mxu0 %v10773_v7  ;;  %v11711_v7 = vld [vmem:[%s11847_s4] ss:$0 sm:$0xff] }
 0x627   : > { %8455 = vmatprep.subr.mxu0 %v10576_v45 }
 0x629   : > { %8409 = vmatmul.mubr.f32.gmra.mrb[34].mxu0 %v11467_v30 }
 0x62a   : > { %8411 = vmatprep.mubr.f32.mxu0 %v11487_v37 }
 0x62d   : > { %8412 = vmatmul.mubr.f32.gmra.mrb[36].mxu0 %v11482_v49 }
 0x62e   : > { %8414 = vmatprep.mubr.f32.mxu0 %v11504_v32 }
 0x631   : > { %8415 = vmatmul.mubr.f32.gmra.mrb[38].mxu0 %v11506_v55 }
 0x632   : > { %8417 = vmatprep.mubr.f32.mxu0 %v11522_v0 }
 0x635   : > { %8418 = vmatmul.mubr.f32.gmra.mrb[40].mxu0 %v11524_v48 }
 0x636   : > { %8420 = vmatprep.mubr.f32.mxu0 %v11544_v23 }
 0x639   : > { %8421 = vmatmul.mubr.f32.gmra.mrb[42].mxu0 %v11536_v42 }
 0x63a   : > { %8423 = vmatprep.mubr.f32.mxu0 %v11564_v19 }
 0x63d   : > { %8424 = vmatmul.mubr.f32.gmra.mrb[44].mxu0 %v11566_v43 }
 0x63e   : > { %8426 = vmatprep.mubr.f32.mxu0 %v11586_v24 }
 0x641   : > { %8427 = vmatmul.mubr.f32.gmra.mrb[46].mxu0 %v11582_v46 }
 0x642   : > { %8431 = vmatprep.mubr.f32.mxu0 %v11456_v14 }
 0x645   : > { %8432 = vmatmul.mubr.f32.vlgmr.msra.gmra.mrb[32].mxu0 %v11453_v41 }
 0x646   : > { %8434 = vmatprep.mubr.f32.mxu0 %v11473_v11  ;;  %8456 = vmatpush3.msra.mxu0 %v10576_v45 }
 0x647   : > { %8481 = vmatprep.subr.mxu0 %v10776_v5 }
 0x649   : > { %8435 = vmatmul.mubr.f32.gmra.mrb[34].mxu0 %v11477_v61  ;;  %v12150_v61 = vld [vmem:[#allocation15_spill] sm:$0xff] }
 0x64a   : > { %8437 = vmatprep.mubr.f32.mxu0 %v11498_v35 }
 0x64d   : > { %8438 = vmatmul.mubr.f32.gmra.mrb[36].mxu0 %v11494_v51 }
 0x64e   : > { %8440 = vmatprep.mubr.f32.mxu0 %v11517_v33 }
 0x651   : > { %8441 = vmatmul.mubr.f32.gmra.mrb[38].mxu0 %v11520_v28 }
 0x652   : > { %8443 = vmatprep.mubr.f32.mxu0 %v11530_v29 }
 0x655   : > { %8444 = vmatmul.mubr.f32.gmra.mrb[40].mxu0 %v11533_v38  ;;  %v12154_v38 = vld [vmem:[#allocation12_spill] sm:$0xff] }
 0x656   : > { %8446 = vmatprep.mubr.f32.mxu0 %v11552_v63  ;;  %v12155_v63 = vld [vmem:[#allocation22_spill] sm:$0xff] }
 0x659   : > { %8447 = vmatmul.mubr.f32.gmra.mrb[42].mxu0 %v11549_v15 }
 0x65a   : > { %8449 = vmatprep.mubr.f32.mxu0 %v11572_v4 }
 0x65d   : > { %8450 = vmatmul.mubr.f32.gmra.mrb[44].mxu0 %v11575_v6 }
 0x65e   : > { %8452 = vmatprep.mubr.f32.mxu0 %v11595_v58  ;;  %v12158_v58 = vld [vmem:[#allocation25_spill] sm:$0xff] }
 0x661   : > { %8453 = vmatmul.mubr.f32.gmra.mrb[46].mxu0 %v11589_v40 }
 0x662   : > { %8457 = vmatprep.mubr.f32.mxu0 %v5428_v54 }
 0x665   : > { %8458 = vmatmul.mubr.f32.vlgmr.msra.gmra.mrb[32].mxu0 %v5438_v13 }
 0x666   : > { %8460 = vmatprep.mubr.f32.mxu0 %v5448_v26  ;;  %8482 = vmatpush3.msra.mxu0 %v10776_v5 }
 0x667   : > { %8507 = vmatprep.subr.mxu0 %v10576_v45 }
 0x669   : > { %8461 = vmatmul.mubr.f32.gmra.mrb[34].mxu0 %v5458_v52 }
 0x66a   : > { %8463 = vmatprep.mubr.f32.mxu0 %v5468_v39  ;;  %v12152_v39 = vld [vmem:[#allocation17_spill] sm:$0xff] }
 0x66d   : > { %8464 = vmatmul.mubr.f32.gmra.mrb[36].mxu0 %v5478_v44 }
 0x66e   : > { %8466 = vmatprep.mubr.f32.mxu0 %v5488_v59 }
 0x671   : > { %8467 = vmatmul.mubr.f32.gmra.mrb[38].mxu0 %v5498_v18 }
 0x672   : > { %8469 = vmatprep.mubr.f32.mxu0 %v5508_v62 }
 0x675   : > { %8470 = vmatmul.mubr.f32.gmra.mrb[40].mxu0 %v5518_v9 }
 0x676   : > { %8472 = vmatprep.mubr.f32.mxu0 %v5528_v36 }
 0x679   : > { %8473 = vmatmul.mubr.f32.gmra.mrb[42].mxu0 %v5538_v27 }
 0x67a   : > { %8475 = vmatprep.mubr.f32.mxu0 %v5548_v21 }
 0x67d   : > { %8476 = vmatmul.mubr.f32.gmra.mrb[44].mxu0 %v5558_v50  ;;  %v12157_v50 = vld [vmem:[#allocation24_spill] sm:$0xff] }
 0x67e   : > { %8478 = vmatprep.mubr.f32.mxu0 %v5568_v53 }
 0x681   : > { %8479 = vmatmul.mubr.f32.gmra.mrb[46].mxu0 %v5578_v22 }
 0x682   : > { %8483 = vmatprep.mubr.f32.mxu0 %v11450_v20 }
 0x685   : > { %8484 = vmatmul.mubr.f32.vlgmr.msra.gmra.mrb[32].mxu0 %v11447_v1 }
 0x686   : > { %8486 = vmatprep.mubr.f32.mxu0 %v11462_v12  ;;  %8508 = vmatpush3.msra.mxu0 %v10576_v45 }
 0x689   : > { %8487 = vmatmul.mubr.f32.gmra.mrb[34].mxu0 %v11467_v30 }
 0x68a   : > { %8489 = vmatprep.mubr.f32.mxu0 %v11487_v37 }
 0x68d   : > { %8490 = vmatmul.mubr.f32.gmra.mrb[36].mxu0 %v11482_v49 }
 0x68e   : > { %8492 = vmatprep.mubr.f32.mxu0 %v11504_v32 }
 0x691   : > { %8493 = vmatmul.mubr.f32.gmra.mrb[38].mxu0 %v11506_v55 }
 0x692   : > { %8495 = vmatprep.mubr.f32.mxu0 %v11522_v0 }
 0x695   : > { %8496 = vmatmul.mubr.f32.gmra.mrb[40].mxu0 %v11524_v48 }
 0x696   : > { %8498 = vmatprep.mubr.f32.mxu0 %v11544_v23 }
 0x699   : > { %8499 = vmatmul.mubr.f32.gmra.mrb[42].mxu0 %v11536_v42 }
 0x69a   : > { %8501 = vmatprep.mubr.f32.mxu0 %v11564_v19 }
 0x69d   : > { %8502 = vmatmul.mubr.f32.gmra.mrb[44].mxu0 %v11566_v43 }
 0x69e   : > { %8504 = vmatprep.mubr.f32.mxu0 %v11586_v24 }
 0x6a1   : > { %8505 = vmatmul.mubr.f32.gmra.mrb[46].mxu0 %v11582_v46 }
 0x6a2   : > { %8509 = vmatprep.mubr.f32.mxu0 %v11450_v20  ;;  %v11719_v20 = vld [vmem:[%s11848_s5] ss:$0 sm:$0xff] }
 0x6a5   : > { %8510 = vmatmul.mubr.f32.vlgmr.msra.gmra.mrb[32].mxu0 %v11447_v1 }
 0x6a6   : > { %8512 = vmatprep.mubr.f32.mxu0 %v11462_v12 }
 0x6a9   : > { %8513 = vmatmul.mubr.f32.gmra.mrb[34].mxu0 %v11467_v30 }
 0x6aa   : > { %8515 = vmatprep.mubr.f32.mxu0 %v11487_v37  ;;  %v12151_v37 = vld [vmem:[#allocation16_spill] sm:$0xff] }
 0x6ad   : > { %8516 = vmatmul.mubr.f32.gmra.mrb[36].mxu0 %v11482_v49 }
 0x6ae   : > { %8518 = vmatprep.mubr.f32.mxu0 %v11504_v32 }
 0x6b1   : > { %8519 = vmatmul.mubr.f32.gmra.mrb[38].mxu0 %v11506_v55 }
 0x6b2   : > { %8521 = vmatprep.mubr.f32.mxu0 %v11522_v0 }
 0x6b5   : > { %8522 = vmatmul.mubr.f32.gmra.mrb[40].mxu0 %v11524_v48  ;;  %v12153_v48 = vld [vmem:[#allocation18_spill] sm:$0xff] }
 0x6b6   : > { %8524 = vmatprep.mubr.f32.mxu0 %v11544_v23 }
 0x6b9   : > { %8525 = vmatmul.mubr.f32.gmra.mrb[42].mxu0 %v11536_v42 }
 0x6ba   : > { %8527 = vmatprep.mubr.f32.mxu0 %v11564_v19 }
 0x6bd   : > { %8528 = vmatmul.mubr.f32.gmra.mrb[44].mxu0 %v11566_v43  ;;  %v12156_v43 = vld [vmem:[#allocation23_spill] sm:$0xff] }
 0x6be   : > { %8530 = vmatprep.mubr.f32.mxu0 %v11586_v24 }
 0x6c1   : > { %8531 = vmatmul.mubr.f32.gmra.mrb[46].mxu0 %v11582_v46 }
 0x778   : > { %v8511_v45 = vpop.f32.mrb[32].mxu0 }
 0x779   : > { %v6452_v5 = vmul.f32 %v8511_v45, %v11048_v60  ;;  %v6357_v1 = vpop.f32.mrb[33].mxu0 }
 0x77a   : > { %v6451_v41 = vmul.f32 %v6357_v1, %v11051_v31 }
 0x77b   : > { %v6475_v14 = vmul.f32 %v11711_v7, %v6452_v5 }
 0x77c   : > { %v6474_v13 = vmul.f32 %v11711_v7, %v6451_v41  ;;  %v8514_v54 = vpop.f32.mrb[34].mxu0 }
 0x77d   : > { %v6498_v12 = vadd.f32 %v11719_v20, %v6475_v14  ;;  %v6454_v30 = vmul.f32 %v8514_v54, %v11060_v8  ;;  %v6369_v11 = vpop.f32.mrb[35].mxu0 }
 0x77e   : > { %v6497_v60 = vadd.f32 %v11719_v20, %v6474_v13  ;;  %v6453_v26 = vmul.f32 %v6369_v11, %v12150_v61  ;;  %v12161_v13 = vld [vmem:[#allocation30_spill] sm:$0xff]  ;;  %v12162_v11 = vld [vmem:[#allocation31_spill] sm:$0xff] }
 0x77f   : > { %6514 = vst [vmem:[%s11728_s12 + $0x8] sm:$0xff] %v6498_v12  ;;  %v6477_v31 = vmul.f32 %v11711_v7, %v6454_v30 }
 0x780   : > { %6513 = vst [vmem:[%s11728_s12] sm:$0xff] %v6497_v60  ;;  %v6476_v52 = vmul.f32 %v11711_v7, %v6453_v26  ;;  %v8517_v49 = vpop.f32.mrb[36].mxu0 }
 0x781   : > { %v6500_v8 = vadd.f32 %v11719_v20, %v6477_v31  ;;  %v6456_v51 = vmul.f32 %v8517_v49, %v12151_v37  ;;  %v6381_v35 = vpop.f32.mrb[37].mxu0 }
 0x782   : > { %v6499_v44 = vadd.f32 %v11719_v20, %v6476_v52  ;;  %v6455_v32 = vmul.f32 %v6381_v35, %v12152_v39 }
 0x783   : > { %6516 = vst [vmem:[%s11728_s12 + $0x18] sm:$0xff] %v6500_v8  ;;  %v6479_v55 = vmul.f32 %v11711_v7, %v6456_v51 }
 0x784   : > { %6515 = vst [vmem:[%s11728_s12 + $0x10] sm:$0xff] %v6499_v44  ;;  %v6478_v33 = vmul.f32 %v11711_v7, %v6455_v32  ;;  %v8520_v28 = vpop.f32.mrb[38].mxu0 }
 0x785   : > { %v6502_v0 = vadd.f32 %v11719_v20, %v6479_v55  ;;  %v6458_v59 = vmul.f32 %v8520_v28, %v12153_v48  ;;  %v6393_v18 = vpop.f32.mrb[39].mxu0 }
 0x786   : > { %v6501_v29 = vadd.f32 %v11719_v20, %v6478_v33  ;;  %v6457_v42 = vmul.f32 %v6393_v18, %v12154_v38 }
 0x787   : > { %6518 = vst [vmem:[%s11728_s12 + $0x28] sm:$0xff] %v6502_v0  ;;  %v6481_v23 = vmul.f32 %v11711_v7, %v6458_v59 }
 0x788   : > { %6517 = vst [vmem:[%s11728_s12 + $0x20] sm:$0xff] %v6501_v29  ;;  %v6480_v62 = vmul.f32 %v11711_v7, %v6457_v42  ;;  %v8523_v9 = vpop.f32.mrb[40].mxu0 }
 0x789   : > { %v6504_v15 = vadd.f32 %v11719_v20, %v6481_v23  ;;  %v6460_v27 = vmul.f32 %v8523_v9, %v12155_v63  ;;  %v6405_v36 = vpop.f32.mrb[41].mxu0 }
 0x78a   : > { %v6503_v19 = vadd.f32 %v11719_v20, %v6480_v62  ;;  %v6459_v4 = vmul.f32 %v6405_v36, %v12156_v43 }
 0x78b   : > { %6520 = vst [vmem:[%s11728_s12 + $0x38] sm:$0xff] %v6504_v15  ;;  %v6483_v6 = vmul.f32 %v11711_v7, %v6460_v27 }
 0x78c   : > { %6519 = vst [vmem:[%s11728_s12 + $0x30] sm:$0xff] %v6503_v19  ;;  %v6482_v46 = vmul.f32 %v11711_v7, %v6459_v4  ;;  %v8526_v10 = vpop.f32.mrb[42].mxu0 }
 0x78d   : > { %v6506_v21 = vadd.f32 %v11719_v20, %v6483_v6  ;;  %v6462_v24 = vmul.f32 %v8526_v10, %v12157_v50  ;;  %v6417_v40 = vpop.f32.mrb[43].mxu0 }
 0x78e   : > { %v6505_v25 = vadd.f32 %v11719_v20, %v6482_v46  ;;  %v6461_v34 = vmul.f32 %v6417_v40, %v12158_v58 }
 0x78f   : > { %6522 = vst [vmem:[%s11728_s12 + $0x48] sm:$0xff] %v6506_v21  ;;  %v6485_v57 = vmul.f32 %v11711_v7, %v6462_v24 }
 0x790   : > { %6521 = vst [vmem:[%s11728_s12 + $0x40] sm:$0xff] %v6505_v25  ;;  %v6484_v22 = vmul.f32 %v11711_v7, %v6461_v34  ;;  %v8529_v3 = vpop.f32.mrb[44].mxu0 }
 0x791   : > { %v6508_v53 = vadd.f32 %v11719_v20, %v6485_v57  ;;  %v6464_v2 = vmul.f32 %v8529_v3, %v12159_v56  ;;  %v6429_v47 = vpop.f32.mrb[45].mxu0 }
 0x792   : > { %v6507_v17 = vadd.f32 %v11719_v20, %v6484_v22  ;;  %v6463_v45 = vmul.f32 %v6429_v47, %v12160_v16 }
 0x793   : > { %6524 = vst [vmem:[%s11728_s12 + $0x58] sm:$0xff] %v6508_v53  ;;  %v6487_v5 = vmul.f32 %v11711_v7, %v6464_v2 }
 0x794   : > { %6523 = vst [vmem:[%s11728_s12 + $0x50] sm:$0xff] %v6507_v17  ;;  %v6486_v1 = vmul.f32 %v11711_v7, %v6463_v45  ;;  %v8532_v41 = vpop.f32.mrb[46].mxu0 }
 0x795   : > { %v6510_v14 = vadd.f32 %v11719_v20, %v6487_v5  ;;  %v6466_v54 = vmul.f32 %v8532_v41, %v12161_v13  ;;  %v6441_v12 = vpop.f32.mrb[47].mxu0 }
 0x796   : > { %v6509_v30 = vadd.f32 %v11719_v20, %v6486_v1  ;;  %v6465_v60 = vmul.f32 %v6441_v12, %v12162_v11 }
 0x797   : > { %6526 = vst [vmem:[%s11728_s12 + $0x68] sm:$0xff] %v6510_v14  ;;  %v6489_v61 = vmul.f32 %v11711_v7, %v6466_v54 }
 0x798   : > { %6525 = vst [vmem:[%s11728_s12 + $0x60] sm:$0xff] %v6509_v30  ;;  %v6488_v26 = vmul.f32 %v11711_v7, %v6465_v60 }
 0x799   : > { %v6512_v31 = vadd.f32 %v11719_v20, %v6489_v61 }
 0x79a   : > { %v6511_v52 = vadd.f32 %v11719_v20, %v6488_v26 }
 0x79b   : > { %6528 = vst [vmem:[%s11728_s12 + $0x78] sm:$0xff] %v6512_v31 }
 0x79c   : > { %6527 = vst [vmem:[%s11728_s12 + $0x70] sm:$0xff] %v6511_v52 }
 0x79d   : > { %9509 = shalt.err (!%p9506_p5)
}
 0x79e   : > { %s9510_s16 = scalar_lea.hbm %s11787_s30, 2048  ;;  %s9514_s14 = scalar_lea.hbm %s11849_s6, 8192 }
 0x79f   : > { %p9511_p6 = scmp.ne.s32.totalorder %s11787_s30, %s9510_s16  ;;  %p9515_p12 = scmp.lt.u32.totalorder %s11787_s30, %s11849_s6 }
 0x7a0   : > { %p9516_p0 = scmp.lt.u32.totalorder %s9514_s14, %s9510_s16  ;;  %p9518_p4 = scmp.lt.u32.totalorder %s9510_s16, %s11787_s30 }
 0x7a1   : > { %p9512_p7 = pnand %p9511_p6, %p12163_p8 }
 0x7a2   : > { %p9517_p2 = por %p9516_p0, %p9515_p12 }
 0x7a3   : > { %p9513_p9 = pneg %p9512_p7 }
 0x7a4   : > { %p9519_p10 = por %p9518_p4, %p9517_p2 }
 0x7a6   : > { %p9520_p11 = pnand %p9519_p10, %p9513_p9 }
 0x7a8   : > { %9523 = shalt.err (!%p9520_p11)
}
 0x7a9   : > { %s9584_s27 = smov 128   ;;  %s9585_s28 = smov 512  }
 0x7aa   : > { %s9586_s8 = smov 8  }
 0x7ab   : > { %9369 = dma.vmem_to_hbm [thread:$0]  (%p12163_p8), %s11790_s20, 2048, %s11787_s30, %s11797_s24, %s9584_s27, %s9585_s28, %s9586_s8  }
 0x7ac PF: > { %p9381_p13 = scmp.ge.s32.totalorder %s9578_s26, 2  ;;  %s6560_s13 = sand.u32 1, %s9558_s21  }
 0x7ad   : > { %p12164_p1 = scmp.ne.s32.totalorder %s11981_s9, 0  ;;  %s6561_s17 = scalar_lea.sflag [#allocation4], %s6560_s13 }
 0x7af   : > { %p9376_p3 = pnand %p9381_p13, %p12164_p1 }
 0x7b1   : > { %9553 = dma.done.wait (!%p9376_p3), %s6561_s17, 2048  }
 0x7b2   : > { %9555 = vsyncadd (!%p9376_p3), %s6561_s17, 4294965248  ;;  %s20_s26 = sadd.s32 1, %s9578_s26   ;;  %s12165_s21 = smov %s9562_s22 }
 0x7b3   : > { %p17_p5 = scmp.ge.s32.totalorder %s20_s26, 6   ;;  %s12166_s22 = smov %s9566_s23 }
 0x7b4   : > { %s12167_s23 = smov %s9675_s10  ;;  %s12168_s24 = smov %s9574_s25 }
 0x7b5   : > { %s12169_s25 = smov %s12171_s29  ;;  %19 = sbr.rel (!%p17_p5) target bundleno = 5 (0x5), region = 85 }
 0x7bc   :  { %6566 = vsyncpa [#allocation3], 1 }
 0x7bd   :  { %6568 = vsyncpa [#allocation3 + $0x1], 1 }
 0x7be   :  { %6569 = vsyncpa [#allocation4], 1 }
 0x7bf   :  { %6571 = vsyncpa [#allocation4 + $0x1], 1 }

</bundles_post_ra>
